<compile_context>
chip_gen: v7x
topology: tpu7x:2x2x1
jax: 0.10.0
libtpu: 0.0.40
codegen_flags: <defaults>
</compile_context>

<pallas_src>
import functools

import jax
import jax.numpy as jnp
import numpy as np
from jax.experimental import pallas as pl
from jax.experimental.pallas import tpu as pltpu


def conv_encoder_kernel(mask_ref, x_ref, w1_ref, w2_ref, wh_ref, whd_ref,
                        eps_ref, out_ref, p2_ref, *, W):
    """Fused encoder forward for one block of block_n images.

    mask_ref: (9, T)       per-tap validity masks (0/1 f32), resident
    x_ref:    (1, 1, T)    block_n flattened images, T = block_n*H*W lanes
    w1_ref:   (Hd, 9)      conv1 weights, [out_ch, 3*(oy+1)+(ox+1)]
    w2_ref:   (2Hd, 9Hd)   conv2 im2col weights, [out_ch, tap*Hd + in_ch]
    wh_ref:   (4Hd, 2Hd)   h_layer weight (out, in)
    whd_ref:  (2L, 4Hd)    fused [z_m ; z_lv] weight (out, in)
    eps_ref:  (1, L, T)    reparametrization noise
    out_ref:  (1, 3L, T)   fused output rows: [z ; z_m ; z_lv]
    p2_ref:   (9Hd, T)     im2col scratch for conv2
    """
    Hd = w1_ref.shape[0]
    L = whd_ref.shape[0] // 2
    T = x_ref.shape[-1]

    offs = [(dy - 1, dx - 1) for dy in range(3) for dx in range(3)]
    shifts = [(-(oy * W + ox)) % T for (oy, ox) in offs]

    # Cache the 8 non-trivial mask rows once (center tap is always valid).
    masks = [None] * 9
    for t in range(9):
        if offs[t] != (0, 0):
            masks[t] = mask_ref[t:t + 1, :]                      # (1, T)

    def tap_of(v, t):
        # Shifted tap of `v` (any (C, T) value): XLU roll + mask kills every
        # row-wrap / image-edge / cross-image-wrap contribution.
        r = v if shifts[t] == 0 else pltpu.roll(v, shifts[t], axis=1)
        return r if offs[t] == (0, 0) else r * masks[t]

    x_row = x_ref[0]                                             # (1, T)

    # ---- conv1 (single input channel): 9 rolled+masked taps, VPU MACs ------
    z1 = jnp.zeros((Hd, T), jnp.float32)
    for t in range(9):
        z1 = z1 + w1_ref[:, t:t + 1] * tap_of(x_row, t)          # (Hd, T)
    z1 = jnp.maximum(z1, 0.0)

    # ---- conv2 as a single im2col matmul (K = 9*Hd) -------------------------
    # Taps built by rolling relu(conv1); each tap block is one aligned,
    # full-lane-width store (sublane offset t*Hd is a multiple of 8).
    for t in range(9):
        p2_ref[t * Hd:(t + 1) * Hd, :] = tap_of(z1, t)
    # NOTE: f32 operands keep PyTorch-level numerics; bf16 cast here would add
    # MXU headroom (esp. v5e) if the tolerance budget allows.
    z2 = jnp.maximum(jnp.dot(w2_ref[...], p2_ref[...],
                             preferred_element_type=jnp.float32), 0.0)   # (2Hd, T)

    # ---- MLP head: h_layer, then fused [z_m ; z_lv] --------------------------
    h = jnp.maximum(jnp.dot(wh_ref[...], z2,
                            preferred_element_type=jnp.float32), 0.0)    # (4Hd, T)
    head = jnp.dot(whd_ref[...], h, preferred_element_type=jnp.float32)  # (2L, T)
    zm = head[:L, :]
    zlv = head[L:, :]
    z = zm + eps_ref[0] * jnp.exp(zlv * 0.5)

    # Single fused output slab: rows [0:L)=z, [L:2L)=z_m, [2L:3L)=z_lv.
    out_ref[0, 0:L, :] = z
    out_ref[0, L:3 * L, :] = head


def _pick_block_n(N, requested=None):
    """Images per grid step: ~8-16, but keep >=2 grid steps so both v7x
    TensorCores get work, and divide the batch evenly."""
    if requested is not None:
        assert N % requested == 0, "batch must be divisible by block_n"
        return requested
    target = max(1, min(16, N // 2)) if N >= 2 else 1
    for b in range(target, 0, -1):
        if N % b == 0:
            return b
    return 1


def conv_encoder_forward(x_nchw, w1, w2, wh, wm, wlv, eps, *, block_n=None):
    """x_nchw: (N, 1, H, W) f32; conv weights HWIO; linear weights (in, out);
    eps: (N, H, W, L).  Returns (z, z_m, z_lv), each (N, H, W, L)."""
    N, Cin, H, W = x_nchw.shape
    assert Cin == 1, "ConvEncoder expects a single input channel"
    Hd = w1.shape[-1]
    C2 = w2.shape[-1]
    C4 = wh.shape[-1]
    L = wm.shape[-1]
    HW = H * W
    B = _pick_block_n(N, block_n)
    G = N // B
    T = B * HW

    # ---- layout glue (cheap reshape/transpose on HBM arrays) -----------------
    x_rows = x_nchw.astype(jnp.float32).reshape(G, 1, T)
    w1_t = w1.reshape(9, Hd).T                        # (Hd, 9)
    w2_t = w2.reshape(9 * Hd, C2).T                   # (C2, 9*Hd) im2col weight
    wh_t = wh.T                                       # (C4, C2)
    whd_t = jnp.concatenate([wm, wlv], axis=1).T      # (2L, C4)  fused head
    eps_t = (eps.reshape(N, HW, L).transpose(0, 2, 1)
                .reshape(G, B, L, HW).transpose(0, 2, 1, 3).reshape(G, L, T))

    # ---- 3x3-tap validity masks: batch-invariant, computed ONCE host-side ----
    hh, ww = np.divmod(np.arange(HW), W)
    m_rows = []
    for oy in (-1, 0, 1):
        for ox in (-1, 0, 1):
            valid = ((hh + oy >= 0) & (hh + oy < H) &
                     (ww + ox >= 0) & (ww + ox < W)).astype(np.float32)
            m_rows.append(np.tile(valid, B))
    mask = jnp.asarray(np.stack(m_rows))              # (9, T)

    kernel = functools.partial(conv_encoder_kernel, W=W)
    grid_spec = pltpu.PrefetchScalarGridSpec(
        num_scalar_prefetch=0,
        grid=(G,),
        in_specs=[
            pl.BlockSpec((9, T), lambda g: (0, 0)),            # masks (resident)
            pl.BlockSpec((1, 1, T), lambda g: (g, 0, 0)),      # images
            pl.BlockSpec((Hd, 9), lambda g: (0, 0)),           # conv1 w
            pl.BlockSpec((C2, 9 * Hd), lambda g: (0, 0)),      # conv2 w (im2col)
            pl.BlockSpec((C4, C2), lambda g: (0, 0)),          # h_layer w
            pl.BlockSpec((2 * L, C4), lambda g: (0, 0)),       # fused head w
            pl.BlockSpec((1, L, T), lambda g: (g, 0, 0)),      # eps
        ],
        out_specs=pl.BlockSpec((1, 3 * L, T), lambda g: (g, 0, 0)),
        scratch_shapes=[pltpu.VMEM((9 * Hd, T), jnp.float32)],  # im2col matrix
    )
    out = pl.pallas_call(
        kernel,
        out_shape=jax.ShapeDtypeStruct((G, 3 * L, T), jnp.float32),
        grid_spec=grid_spec,
        compiler_params=pltpu.CompilerParams(
            dimension_semantics=("parallel",),
            vmem_limit_bytes=32 * 1024 * 1024,
        ),
    )(mask, x_rows, w1_t, w2_t, wh_t, whd_t, eps_t)

    out5 = out.reshape(G, 3, L, B, HW)

    def to_nhwl(a):                                   # (G, L, B, HW) -> (N, H, W, L)
        return a.transpose(0, 2, 3, 1).reshape(N, H, W, L)

    return to_nhwl(out5[:, 0]), to_nhwl(out5[:, 1]), to_nhwl(out5[:, 2])


def reference_forward(x_nchw, w1, w2, wh, wm, wlv, eps):
    """Pure-JAX reference (same math, same eps) for correctness checking."""
    x = jnp.transpose(x_nchw, (0, 2, 3, 1))
    dn1 = jax.lax.conv_dimension_numbers(x.shape, w1.shape, ("NHWC", "HWIO", "NHWC"))
    z = jax.lax.conv_general_dilated(x, w1, (1, 1), "SAME", dimension_numbers=dn1)
    z = jnp.maximum(z, 0.0)
    dn2 = jax.lax.conv_dimension_numbers(z.shape, w2.shape, ("NHWC", "HWIO", "NHWC"))
    z = jax.lax.conv_general_dilated(z, w2, (1, 1), "SAME", dimension_numbers=dn2)
    z = jnp.maximum(z, 0.0)
    h = jnp.maximum(z @ wh, 0.0)
    zm = h @ wm
    zlv = h @ wlv
    zz = zm + eps * jnp.exp(zlv / 2.0)
    return zz, zm, zlv


if __name__ == "__main__":
    # Small shapes consistent with the module forward.  N=8 so the batched
    # grid has >=2 steps (block_n=4) and both v7x TensorCores get work.
    N, H, W = 8, 16, 16
    hidden_dim = 8
    latent_dim = 8
    Hd, C2, C4, L = hidden_dim, 2 * hidden_dim, 4 * hidden_dim, latent_dim

    key = jax.random.PRNGKey(0)
    kx, k1, k2, kh, km, klv, keps = jax.random.split(key, 7)

    x = jax.random.normal(kx, (N, 1, H, W), dtype=jnp.float32)
    w1 = 0.1 * jax.random.normal(k1, (3, 3, 1, Hd), dtype=jnp.float32)      # HWIO
    w2 = 0.1 * jax.random.normal(k2, (3, 3, Hd, C2), dtype=jnp.float32)     # HWIO
    wh = 0.1 * jax.random.normal(kh, (C2, C4), dtype=jnp.float32)           # (in, out)
    wm = 0.1 * jax.random.normal(km, (C4, L), dtype=jnp.float32)
    wlv = 0.1 * jax.random.normal(klv, (C4, L), dtype=jnp.float32)
    # torch.randn_like(lv) equivalent: noise sampled in glue, not in the kernel.
    eps = jax.random.normal(keps, (N, H, W, L), dtype=jnp.float32)

    fwd = jax.jit(conv_encoder_forward)
    z, z_m, z_lv = fwd(x, w1, w2, wh, wm, wlv, eps)
    jax.block_until_ready((z, z_m, z_lv))

    z_r, zm_r, zlv_r = reference_forward(x, w1, w2, wh, wm, wlv, eps)
    np.testing.assert_allclose(np.asarray(z_m), np.asarray(zm_r), atol=1e-4, rtol=1e-4)
    np.testing.assert_allclose(np.asarray(z_lv), np.asarray(zlv_r), atol=1e-4, rtol=1e-4)
    np.testing.assert_allclose(np.asarray(z), np.asarray(z_r), atol=1e-4, rtol=1e-4)

    print("KERNEL_OK")
</pallas_src>

<mosaic_0001>
module attributes {stable_mosaic.version = 11 : i64} {
  func.func @conv_encoder_kernel(%arg0: i32, %arg1: memref<9x1024xf32, #tpu.memory_space<vmem>>, %arg2: memref<1x1x1024xf32, #tpu.memory_space<vmem>>, %arg3: memref<8x9xf32, #tpu.memory_space<vmem>>, %arg4: memref<16x72xf32, #tpu.memory_space<vmem>>, %arg5: memref<32x16xf32, #tpu.memory_space<vmem>>, %arg6: memref<16x32xf32, #tpu.memory_space<vmem>>, %arg7: memref<1x8x1024xf32, #tpu.memory_space<vmem>>, %arg8: memref<1x24x1024xf32, #tpu.memory_space<vmem>>, %arg9: memref<72x1024xf32, #tpu.memory_space<vmem>>) attributes {dimension_semantics = [#tpu.dimension_semantics<parallel>], iteration_bounds = array<i64: 2>, scalar_prefetch = 0 : i64, scratch_operands = 1 : i64, tpu.core_type = #tpu.core_type<tc>, window_params = [{pipeline_mode = #tpu.pipeline_mode<synchronous>, transform_indices = @transform_0, window_bounds = array<i64: 9, 1024>}, {transform_indices = @transform_1, window_bounds = array<i64: 1, 1, 1024>}, {pipeline_mode = #tpu.pipeline_mode<synchronous>, transform_indices = @transform_2, window_bounds = array<i64: 8, 9>}, {pipeline_mode = #tpu.pipeline_mode<synchronous>, transform_indices = @transform_3, window_bounds = array<i64: 16, 72>}, {pipeline_mode = #tpu.pipeline_mode<synchronous>, transform_indices = @transform_4, window_bounds = array<i64: 32, 16>}, {pipeline_mode = #tpu.pipeline_mode<synchronous>, transform_indices = @transform_5, window_bounds = array<i64: 16, 32>}, {transform_indices = @transform_6, window_bounds = array<i64: 1, 8, 1024>}, {transform_indices = @transform_7, window_bounds = array<i64: 1, 24, 1024>}]} {
    %c0 = arith.constant 0 : index
    %c0_0 = arith.constant 0 : index
    %0 = vector.load %arg1[%c0, %c0_0] : memref<9x1024xf32, #tpu.memory_space<vmem>>, vector<1x1024xf32>
    %c1 = arith.constant 1 : index
    %c0_1 = arith.constant 0 : index
    %1 = vector.load %arg1[%c1, %c0_1] : memref<9x1024xf32, #tpu.memory_space<vmem>>, vector<1x1024xf32>
    %c2 = arith.constant 2 : index
    %c0_2 = arith.constant 0 : index
    %2 = vector.load %arg1[%c2, %c0_2] : memref<9x1024xf32, #tpu.memory_space<vmem>>, vector<1x1024xf32>
    %c3 = arith.constant 3 : index
    %c0_3 = arith.constant 0 : index
    %3 = vector.load %arg1[%c3, %c0_3] : memref<9x1024xf32, #tpu.memory_space<vmem>>, vector<1x1024xf32>
    %c5 = arith.constant 5 : index
    %c0_4 = arith.constant 0 : index
    %4 = vector.load %arg1[%c5, %c0_4] : memref<9x1024xf32, #tpu.memory_space<vmem>>, vector<1x1024xf32>
    %c6 = arith.constant 6 : index
    %c0_5 = arith.constant 0 : index
    %5 = vector.load %arg1[%c6, %c0_5] : memref<9x1024xf32, #tpu.memory_space<vmem>>, vector<1x1024xf32>
    %c7 = arith.constant 7 : index
    %c0_6 = arith.constant 0 : index
    %6 = vector.load %arg1[%c7, %c0_6] : memref<9x1024xf32, #tpu.memory_space<vmem>>, vector<1x1024xf32>
    %c8 = arith.constant 8 : index
    %c0_7 = arith.constant 0 : index
    %7 = vector.load %arg1[%c8, %c0_7] : memref<9x1024xf32, #tpu.memory_space<vmem>>, vector<1x1024xf32>
    %c0_8 = arith.constant 0 : index
    %c0_9 = arith.constant 0 : index
    %c0_10 = arith.constant 0 : index
    %8 = vector.load %arg2[%c0_8, %c0_9, %c0_10] : memref<1x1x1024xf32, #tpu.memory_space<vmem>>, vector<1x1x1024xf32>
    %9 = vector.shape_cast %8 : vector<1x1x1024xf32> to vector<1x1024xf32>
    %cst = arith.constant 0.000000e+00 : f32
    %10 = vector.broadcast %cst : f32 to vector<8x1024xf32>
    %c0_11 = arith.constant 0 : index
    %c0_12 = arith.constant 0 : index
    %11 = vector.load %arg3[%c0_11, %c0_12] : memref<8x9xf32, #tpu.memory_space<vmem>>, vector<8x1xf32>
    %c17_i32 = arith.constant 17 : i32
    %12 = tpu.dynamic_rotate %9 by %c17_i32 dim 1 : vector<1x1024xf32>, i32 -> vector<1x1024xf32>
    %13 = arith.mulf %12, %0 : vector<1x1024xf32>
    %14 = vector.broadcast %11 : vector<8x1xf32> to vector<8x1024xf32>
    %15 = vector.broadcast %13 : vector<1x1024xf32> to vector<8x1024xf32>
    %16 = arith.mulf %14, %15 : vector<8x1024xf32>
    %17 = arith.addf %10, %16 : vector<8x1024xf32>
    %c0_13 = arith.constant 0 : index
    %c1_14 = arith.constant 1 : index
    %18 = vector.load %arg3[%c0_13, %c1_14] : memref<8x9xf32, #tpu.memory_space<vmem>>, vector<8x1xf32>
    %c16_i32 = arith.constant 16 : i32
    %19 = tpu.dynamic_rotate %9 by %c16_i32 dim 1 : vector<1x1024xf32>, i32 -> vector<1x1024xf32>
    %20 = arith.mulf %19, %1 : vector<1x1024xf32>
    %21 = vector.broadcast %18 : vector<8x1xf32> to vector<8x1024xf32>
    %22 = vector.broadcast %20 : vector<1x1024xf32> to vector<8x1024xf32>
    %23 = arith.mulf %21, %22 : vector<8x1024xf32>
    %24 = arith.addf %17, %23 : vector<8x1024xf32>
    %c0_15 = arith.constant 0 : index
    %c2_16 = arith.constant 2 : index
    %25 = vector.load %arg3[%c0_15, %c2_16] : memref<8x9xf32, #tpu.memory_space<vmem>>, vector<8x1xf32>
    %c15_i32 = arith.constant 15 : i32
    %26 = tpu.dynamic_rotate %9 by %c15_i32 dim 1 : vector<1x1024xf32>, i32 -> vector<1x1024xf32>
    %27 = arith.mulf %26, %2 : vector<1x1024xf32>
    %28 = vector.broadcast %25 : vector<8x1xf32> to vector<8x1024xf32>
    %29 = vector.broadcast %27 : vector<1x1024xf32> to vector<8x1024xf32>
    %30 = arith.mulf %28, %29 : vector<8x1024xf32>
    %31 = arith.addf %24, %30 : vector<8x1024xf32>
    %c0_17 = arith.constant 0 : index
    %c3_18 = arith.constant 3 : index
    %32 = vector.load %arg3[%c0_17, %c3_18] : memref<8x9xf32, #tpu.memory_space<vmem>>, vector<8x1xf32>
    %c1_i32 = arith.constant 1 : i32
    %33 = tpu.dynamic_rotate %9 by %c1_i32 dim 1 : vector<1x1024xf32>, i32 -> vector<1x1024xf32>
    %34 = arith.mulf %33, %3 : vector<1x1024xf32>
    %35 = vector.broadcast %32 : vector<8x1xf32> to vector<8x1024xf32>
    %36 = vector.broadcast %34 : vector<1x1024xf32> to vector<8x1024xf32>
    %37 = arith.mulf %35, %36 : vector<8x1024xf32>
    %38 = arith.addf %31, %37 : vector<8x1024xf32>
    %c0_19 = arith.constant 0 : index
    %c4 = arith.constant 4 : index
    %39 = vector.load %arg3[%c0_19, %c4] : memref<8x9xf32, #tpu.memory_space<vmem>>, vector<8x1xf32>
    %40 = vector.broadcast %39 : vector<8x1xf32> to vector<8x1024xf32>
    %41 = vector.broadcast %9 : vector<1x1024xf32> to vector<8x1024xf32>
    %42 = arith.mulf %40, %41 : vector<8x1024xf32>
    %43 = arith.addf %38, %42 : vector<8x1024xf32>
    %c0_20 = arith.constant 0 : index
    %c5_21 = arith.constant 5 : index
    %44 = vector.load %arg3[%c0_20, %c5_21] : memref<8x9xf32, #tpu.memory_space<vmem>>, vector<8x1xf32>
    %c1023_i32 = arith.constant 1023 : i32
    %45 = tpu.dynamic_rotate %9 by %c1023_i32 dim 1 : vector<1x1024xf32>, i32 -> vector<1x1024xf32>
    %46 = arith.mulf %45, %4 : vector<1x1024xf32>
    %47 = vector.broadcast %44 : vector<8x1xf32> to vector<8x1024xf32>
    %48 = vector.broadcast %46 : vector<1x1024xf32> to vector<8x1024xf32>
    %49 = arith.mulf %47, %48 : vector<8x1024xf32>
    %50 = arith.addf %43, %49 : vector<8x1024xf32>
    %c0_22 = arith.constant 0 : index
    %c6_23 = arith.constant 6 : index
    %51 = vector.load %arg3[%c0_22, %c6_23] : memref<8x9xf32, #tpu.memory_space<vmem>>, vector<8x1xf32>
    %c1009_i32 = arith.constant 1009 : i32
    %52 = tpu.dynamic_rotate %9 by %c1009_i32 dim 1 : vector<1x1024xf32>, i32 -> vector<1x1024xf32>
    %53 = arith.mulf %52, %5 : vector<1x1024xf32>
    %54 = vector.broadcast %51 : vector<8x1xf32> to vector<8x1024xf32>
    %55 = vector.broadcast %53 : vector<1x1024xf32> to vector<8x1024xf32>
    %56 = arith.mulf %54, %55 : vector<8x1024xf32>
    %57 = arith.addf %50, %56 : vector<8x1024xf32>
    %c0_24 = arith.constant 0 : index
    %c7_25 = arith.constant 7 : index
    %58 = vector.load %arg3[%c0_24, %c7_25] : memref<8x9xf32, #tpu.memory_space<vmem>>, vector<8x1xf32>
    %c1008_i32 = arith.constant 1008 : i32
    %59 = tpu.dynamic_rotate %9 by %c1008_i32 dim 1 : vector<1x1024xf32>, i32 -> vector<1x1024xf32>
    %60 = arith.mulf %59, %6 : vector<1x1024xf32>
    %61 = vector.broadcast %58 : vector<8x1xf32> to vector<8x1024xf32>
    %62 = vector.broadcast %60 : vector<1x1024xf32> to vector<8x1024xf32>
    %63 = arith.mulf %61, %62 : vector<8x1024xf32>
    %64 = arith.addf %57, %63 : vector<8x1024xf32>
    %c0_26 = arith.constant 0 : index
    %c8_27 = arith.constant 8 : index
    %65 = vector.load %arg3[%c0_26, %c8_27] : memref<8x9xf32, #tpu.memory_space<vmem>>, vector<8x1xf32>
    %c1007_i32 = arith.constant 1007 : i32
    %66 = tpu.dynamic_rotate %9 by %c1007_i32 dim 1 : vector<1x1024xf32>, i32 -> vector<1x1024xf32>
    %67 = arith.mulf %66, %7 : vector<1x1024xf32>
    %68 = vector.broadcast %65 : vector<8x1xf32> to vector<8x1024xf32>
    %69 = vector.broadcast %67 : vector<1x1024xf32> to vector<8x1024xf32>
    %70 = arith.mulf %68, %69 : vector<8x1024xf32>
    %71 = arith.addf %64, %70 : vector<8x1024xf32>
    %cst_28 = arith.constant 0.000000e+00 : f32
    %72 = vector.broadcast %cst_28 : f32 to vector<8x1024xf32>
    %73 = arith.maximumf %71, %72 : vector<8x1024xf32>
    %c17_i32_29 = arith.constant 17 : i32
    %74 = tpu.dynamic_rotate %73 by %c17_i32_29 dim 1 : vector<8x1024xf32>, i32 -> vector<8x1024xf32>
    %75 = vector.broadcast %0 : vector<1x1024xf32> to vector<8x1024xf32>
    %76 = arith.mulf %74, %75 : vector<8x1024xf32>
    %c0_30 = arith.constant 0 : index
    %c0_31 = arith.constant 0 : index
    %77 = vector.load %arg9[%c0_30, %c0_31] : memref<72x1024xf32, #tpu.memory_space<vmem>>, vector<8x1024xf32>
    tpu.vector_store %arg9[%c0_30, %c0_31], %76 {strides = array<i32>} : memref<72x1024xf32, #tpu.memory_space<vmem>>, vector<8x1024xf32>,
    %c16_i32_32 = arith.constant 16 : i32
    %78 = tpu.dynamic_rotate %73 by %c16_i32_32 dim 1 : vector<8x1024xf32>, i32 -> vector<8x1024xf32>
    %79 = vector.broadcast %1 : vector<1x1024xf32> to vector<8x1024xf32>
    %80 = arith.mulf %78, %79 : vector<8x1024xf32>
    %c8_33 = arith.constant 8 : index
    %c0_34 = arith.constant 0 : index
    %81 = vector.load %arg9[%c8_33, %c0_34] : memref<72x1024xf32, #tpu.memory_space<vmem>>, vector<8x1024xf32>
    tpu.vector_store %arg9[%c8_33, %c0_34], %80 {strides = array<i32>} : memref<72x1024xf32, #tpu.memory_space<vmem>>, vector<8x1024xf32>,
    %c15_i32_35 = arith.constant 15 : i32
    %82 = tpu.dynamic_rotate %73 by %c15_i32_35 dim 1 : vector<8x1024xf32>, i32 -> vector<8x1024xf32>
    %83 = vector.broadcast %2 : vector<1x1024xf32> to vector<8x1024xf32>
    %84 = arith.mulf %82, %83 : vector<8x1024xf32>
    %c16 = arith.constant 16 : index
    %c0_36 = arith.constant 0 : index
    %85 = vector.load %arg9[%c16, %c0_36] : memref<72x1024xf32, #tpu.memory_space<vmem>>, vector<8x1024xf32>
    tpu.vector_store %arg9[%c16, %c0_36], %84 {strides = array<i32>} : memref<72x1024xf32, #tpu.memory_space<vmem>>, vector<8x1024xf32>,
    %c1_i32_37 = arith.constant 1 : i32
    %86 = tpu.dynamic_rotate %73 by %c1_i32_37 dim 1 : vector<8x1024xf32>, i32 -> vector<8x1024xf32>
    %87 = vector.broadcast %3 : vector<1x1024xf32> to vector<8x1024xf32>
    %88 = arith.mulf %86, %87 : vector<8x1024xf32>
    %c24 = arith.constant 24 : index
    %c0_38 = arith.constant 0 : index
    %89 = vector.load %arg9[%c24, %c0_38] : memref<72x1024xf32, #tpu.memory_space<vmem>>, vector<8x1024xf32>
    tpu.vector_store %arg9[%c24, %c0_38], %88 {strides = array<i32>} : memref<72x1024xf32, #tpu.memory_space<vmem>>, vector<8x1024xf32>,
    %c32 = arith.constant 32 : index
    %c0_39 = arith.constant 0 : index
    %90 = vector.load %arg9[%c32, %c0_39] : memref<72x1024xf32, #tpu.memory_space<vmem>>, vector<8x1024xf32>
    tpu.vector_store %arg9[%c32, %c0_39], %73 {strides = array<i32>} : memref<72x1024xf32, #tpu.memory_space<vmem>>, vector<8x1024xf32>,
    %c1023_i32_40 = arith.constant 1023 : i32
    %91 = tpu.dynamic_rotate %73 by %c1023_i32_40 dim 1 : vector<8x1024xf32>, i32 -> vector<8x1024xf32>
    %92 = vector.broadcast %4 : vector<1x1024xf32> to vector<8x1024xf32>
    %93 = arith.mulf %91, %92 : vector<8x1024xf32>
    %c40 = arith.constant 40 : index
    %c0_41 = arith.constant 0 : index
    %94 = vector.load %arg9[%c40, %c0_41] : memref<72x1024xf32, #tpu.memory_space<vmem>>, vector<8x1024xf32>
    tpu.vector_store %arg9[%c40, %c0_41], %93 {strides = array<i32>} : memref<72x1024xf32, #tpu.memory_space<vmem>>, vector<8x1024xf32>,
    %c1009_i32_42 = arith.constant 1009 : i32
    %95 = tpu.dynamic_rotate %73 by %c1009_i32_42 dim 1 : vector<8x1024xf32>, i32 -> vector<8x1024xf32>
    %96 = vector.broadcast %5 : vector<1x1024xf32> to vector<8x1024xf32>
    %97 = arith.mulf %95, %96 : vector<8x1024xf32>
    %c48 = arith.constant 48 : index
    %c0_43 = arith.constant 0 : index
    %98 = vector.load %arg9[%c48, %c0_43] : memref<72x1024xf32, #tpu.memory_space<vmem>>, vector<8x1024xf32>
    tpu.vector_store %arg9[%c48, %c0_43], %97 {strides = array<i32>} : memref<72x1024xf32, #tpu.memory_space<vmem>>, vector<8x1024xf32>,
    %c1008_i32_44 = arith.constant 1008 : i32
    %99 = tpu.dynamic_rotate %73 by %c1008_i32_44 dim 1 : vector<8x1024xf32>, i32 -> vector<8x1024xf32>
    %100 = vector.broadcast %6 : vector<1x1024xf32> to vector<8x1024xf32>
    %101 = arith.mulf %99, %100 : vector<8x1024xf32>
    %c56 = arith.constant 56 : index
    %c0_45 = arith.constant 0 : index
    %102 = vector.load %arg9[%c56, %c0_45] : memref<72x1024xf32, #tpu.memory_space<vmem>>, vector<8x1024xf32>
    tpu.vector_store %arg9[%c56, %c0_45], %101 {strides = array<i32>} : memref<72x1024xf32, #tpu.memory_space<vmem>>, vector<8x1024xf32>,
    %c1007_i32_46 = arith.constant 1007 : i32
    %103 = tpu.dynamic_rotate %73 by %c1007_i32_46 dim 1 : vector<8x1024xf32>, i32 -> vector<8x1024xf32>
    %104 = vector.broadcast %7 : vector<1x1024xf32> to vector<8x1024xf32>
    %105 = arith.mulf %103, %104 : vector<8x1024xf32>
    %c64 = arith.constant 64 : index
    %c0_47 = arith.constant 0 : index
    %106 = vector.load %arg9[%c64, %c0_47] : memref<72x1024xf32, #tpu.memory_space<vmem>>, vector<8x1024xf32>
    tpu.vector_store %arg9[%c64, %c0_47], %105 {strides = array<i32>} : memref<72x1024xf32, #tpu.memory_space<vmem>>, vector<8x1024xf32>,
    %c0_48 = arith.constant 0 : index
    %c0_49 = arith.constant 0 : index
    %107 = vector.load %arg4[%c0_48, %c0_49] : memref<16x72xf32, #tpu.memory_space<vmem>>, vector<16x72xf32>
    %c0_50 = arith.constant 0 : index
    %c0_51 = arith.constant 0 : index
    %108 = vector.load %arg9[%c0_50, %c0_51] : memref<72x1024xf32, #tpu.memory_space<vmem>>, vector<72x1024xf32>
    %cst_52 = arith.constant dense<0.000000e+00> : vector<16x1024xf32>
    %109 = tpu.matmul %107, %108, %cst_52 {dimension_numbers = #tpu.dot_dimension_numbers<[1], [0], [0], [1], [0, 0, 1, 1], [], []>} : vector<16x72xf32>, vector<72x1024xf32>, vector<16x1024xf32> -> vector<16x1024xf32>
    %cst_53 = arith.constant 0.000000e+00 : f32
    %110 = vector.broadcast %cst_53 : f32 to vector<16x1024xf32>
    %111 = arith.maximumf %109, %110 : vector<16x1024xf32>
    %c0_54 = arith.constant 0 : index
    %c0_55 = arith.constant 0 : index
    %112 = vector.load %arg5[%c0_54, %c0_55] : memref<32x16xf32, #tpu.memory_space<vmem>>, vector<32x16xf32>
    %cst_56 = arith.constant dense<0.000000e+00> : vector<32x1024xf32>
    %113 = tpu.matmul %112, %111, %cst_56 {dimension_numbers = #tpu.dot_dimension_numbers<[1], [0], [0], [1], [0, 0, 1, 1], [], []>} : vector<32x16xf32>, vector<16x1024xf32>, vector<32x1024xf32> -> vector<32x1024xf32>
    %cst_57 = arith.constant 0.000000e+00 : f32
    %114 = vector.broadcast %cst_57 : f32 to vector<32x1024xf32>
    %115 = arith.maximumf %113, %114 : vector<32x1024xf32>
    %c0_58 = arith.constant 0 : index
    %c0_59 = arith.constant 0 : index
    %116 = vector.load %arg6[%c0_58, %c0_59] : memref<16x32xf32, #tpu.memory_space<vmem>>, vector<16x32xf32>
    %cst_60 = arith.constant dense<0.000000e+00> : vector<16x1024xf32>
    %117 = tpu.matmul %116, %115, %cst_60 {dimension_numbers = #tpu.dot_dimension_numbers<[1], [0], [0], [1], [0, 0, 1, 1], [], []>} : vector<16x32xf32>, vector<32x1024xf32>, vector<16x1024xf32> -> vector<16x1024xf32>
    %118 = vector.extract_strided_slice %117 {offsets = [0, 0], sizes = [8, 1024], strides = [1, 1]} : vector<16x1024xf32> to vector<8x1024xf32>
    %119 = vector.extract_strided_slice %117 {offsets = [8, 0], sizes = [8, 1024], strides = [1, 1]} : vector<16x1024xf32> to vector<8x1024xf32>
    %c0_61 = arith.constant 0 : index
    %c0_62 = arith.constant 0 : index
    %c0_63 = arith.constant 0 : index
    %120 = vector.load %arg7[%c0_61, %c0_62, %c0_63] : memref<1x8x1024xf32, #tpu.memory_space<vmem>>, vector<1x8x1024xf32>
    %121 = vector.shape_cast %120 : vector<1x8x1024xf32> to vector<8x1024xf32>
    %cst_64 = arith.constant 5.000000e-01 : f32
    %122 = vector.broadcast %cst_64 : f32 to vector<8x1024xf32>
    %123 = arith.mulf %119, %122 : vector<8x1024xf32>
    %124 = math.exp %123 : vector<8x1024xf32>
    %125 = arith.mulf %121, %124 : vector<8x1024xf32>
    %126 = arith.addf %118, %125 : vector<8x1024xf32>
    %c0_65 = arith.constant 0 : index
    %c0_66 = arith.constant 0 : index
    %c0_67 = arith.constant 0 : index
    %127 = vector.load %arg8[%c0_65, %c0_66, %c0_67] : memref<1x24x1024xf32, #tpu.memory_space<vmem>>, vector<1x8x1024xf32>
    %128 = vector.shape_cast %127 : vector<1x8x1024xf32> to vector<8x1024xf32>
    %129 = vector.shape_cast %126 : vector<8x1024xf32> to vector<1x8x1024xf32>
    tpu.vector_store %arg8[%c0_65, %c0_66, %c0_67], %129 {strides = array<i32>} : memref<1x24x1024xf32, #tpu.memory_space<vmem>>, vector<1x8x1024xf32>,
    %c0_68 = arith.constant 0 : index
    %c8_69 = arith.constant 8 : index
    %c0_70 = arith.constant 0 : index
    %130 = vector.load %arg8[%c0_68, %c8_69, %c0_70] : memref<1x24x1024xf32, #tpu.memory_space<vmem>>, vector<1x16x1024xf32>
    %131 = vector.shape_cast %130 : vector<1x16x1024xf32> to vector<16x1024xf32>
    %132 = vector.shape_cast %117 : vector<16x1024xf32> to vector<1x16x1024xf32>
    tpu.vector_store %arg8[%c0_68, %c8_69, %c0_70], %132 {strides = array<i32>} : memref<1x24x1024xf32, #tpu.memory_space<vmem>>, vector<1x16x1024xf32>,
    return
  }
  func.func @transform_0(%arg0: i32) -> (i32, i32) {
    %c0_i32 = arith.constant 0 : i32
    %c0_i32_0 = arith.constant 0 : i32
    %c0_i32_1 = arith.constant 0 : i32
    return %c0_i32, %c0_i32_0 : i32, i32
  }
  func.func @transform_1(%arg0: i32) -> (i32, i32, i32) {
    %c0_i32 = arith.constant 0 : i32
    %c0_i32_0 = arith.constant 0 : i32
    %c0_i32_1 = arith.constant 0 : i32
    return %arg0, %c0_i32, %c0_i32_0 : i32, i32, i32
  }
  func.func @transform_2(%arg0: i32) -> (i32, i32) {
    %c0_i32 = arith.constant 0 : i32
    %c0_i32_0 = arith.constant 0 : i32
    %c0_i32_1 = arith.constant 0 : i32
    return %c0_i32, %c0_i32_0 : i32, i32
  }
  func.func @transform_3(%arg0: i32) -> (i32, i32) {
    %c0_i32 = arith.constant 0 : i32
    %c0_i32_0 = arith.constant 0 : i32
    %c0_i32_1 = arith.constant 0 : i32
    return %c0_i32, %c0_i32_0 : i32, i32
  }
  func.func @transform_4(%arg0: i32) -> (i32, i32) {
    %c0_i32 = arith.constant 0 : i32
    %c0_i32_0 = arith.constant 0 : i32
    %c0_i32_1 = arith.constant 0 : i32
    return %c0_i32, %c0_i32_0 : i32, i32
  }
  func.func @transform_5(%arg0: i32) -> (i32, i32) {
    %c0_i32 = arith.constant 0 : i32
    %c0_i32_0 = arith.constant 0 : i32
    %c0_i32_1 = arith.constant 0 : i32
    return %c0_i32, %c0_i32_0 : i32, i32
  }
  func.func @transform_6(%arg0: i32) -> (i32, i32, i32) {
    %c0_i32 = arith.constant 0 : i32
    %c0_i32_0 = arith.constant 0 : i32
    %c0_i32_1 = arith.constant 0 : i32
    return %arg0, %c0_i32, %c0_i32_0 : i32, i32, i32
  }
  func.func @transform_7(%arg0: i32) -> (i32, i32, i32) {
    %c0_i32 = arith.constant 0 : i32
    %c0_i32_0 = arith.constant 0 : i32
    %c0_i32_1 = arith.constant 0 : i32
    return %arg0, %c0_i32, %c0_i32_0 : i32, i32, i32
  }
}

</mosaic_0001>

<bundles_post_ra>
// kernel: conv_encoder_forward.1
= control target key start
LH: loop header
LB: loop body
LE: loop exit
PB: predicated region body
PF: predicated region fallthrough
CT: control target
= control target key end

     0   :  { %s3292_s24 = smov 0   ;;  %s4981_s0 = inlined_call_operand.vmem [shape: f32[9,1024], index: 0, kind: input, shape index: {}]   ;;  %s4982_s1 = inlined_call_operand.vmem [shape: f32[2,1,1024], index: 1, kind: input, shape index: {}]   ;;  %s4983_s2 = inlined_call_operand.vmem [shape: f32[8,9], index: 2, kind: input, shape index: {}]   ;;  %s4984_s3 = inlined_call_operand.vmem [shape: f32[16,72], index: 3, kind: input, shape index: {}]   ;;  %s4985_s4 = inlined_call_operand.vmem [shape: f32[32,16], index: 4, kind: input, shape index: {}]   ;;  %s4986_s5 = inlined_call_operand.vmem [shape: f32[16,32], index: 5, kind: input, shape index: {}]   ;;  %s4987_s6 = inlined_call_operand.vmem [shape: f32[2,8,1024], index: 6, kind: input, shape index: {}]   ;;  %s4988_s7 = inlined_call_operand.vmem [shape: f32[2,24,1024], index: 7, kind: output, shape index: {}]  }
   0x1 LB: > { %s3003_s25 = sadd.s32 4294967295, %s3232_s24   ;;  %p3007_p0 = scmp.ge.s32.totalorder %s3232_s24, 1  ;;  %s3232_s24 = sphi %s3292_s24, %s17_s24  }
   0x2   : > { %p246_p1 = scmp.lt.s32.totalorder %s3232_s24, 3 }
   0x4   : > { %p247_p2 = pnand %p3007_p0, %p246_p1 }
   0x6   : > { %250 = sbr.rel (%p247_p2) target bundleno = 1215 (0x4bf), region = 48 }
   0xd   : > { %v3303_v0 = vld [vmem:[%s4983_s2] sm:$0xff]  ;;  %p282_p3 = scmp.lt.s32.totalorder %s3003_s25, 1  ;;  %v330_v1 = vlaneseq  ;;  %v3234_v2 = vmov 0   ;;  %v3235_v3 = vmov 2   ;;  %v3236_v8 = vmov 1   ;;  %s3237_s9 = smov 17  }
   0xe   : > { %3200 = vset.pattern.permute.xlu0 %v3234_v2  ;;  %3202 = vset.pattern.permute.xlu1 %v3235_v3  ;;  %v3238_v14 = vmov 4   ;;  %s3239_s10 = smov 16   ;;  %s3240_s11 = smov 15   ;;  %v3241_v20 = vmov 3   ;;  %v3243_v22 = vmov 5   ;;  %v3244_v24 = vmov 8  }
   0xf   : > { %448 = vperm.xlu0 %3200, %v3303_v0   ;;  %s5267_s25 = smov (!%p282_p3, %s3003_s25), 1  ;;  %v3309_v4 = vshrl.u32 %v330_v1, 7  ;;  %s3242_s12 = smov 1   ;;  %v3246_v25 = vmov 6   ;;  %v3248_v26 = vmov 7   ;;  %v3566_v56 = vand.u32 127, %v330_v1 }
  0x10   : > { %s3008_s28 = sshll.u32 %s5267_s25, 3  ;;  %s3245_s13 = smov 127   ;;  %v296_v54 = vld [vmem:[%s4981_s0] ss:$8 sm:$0xf]  ;;  %vm1811_vm8 = vcmask 588800  }
  0x11   : > { %v3313_v5 = vsub.s32 0, %v3309_v4  ;;  %v3316_v6 = vsub.s32 3, %v3309_v4  ;;  %s285_s8 = scalar_lea.vmem %s4982_s1, %s3008_s28  ;;  %v3322_v7 = vsub.s32 1, %v3309_v4  ;;  %v3342_v13 = vsub.s32 2, %v3309_v4  ;;  %s3247_s14 = smov 113  }
  0x12   : > { %v3324_v9 = vld [vmem:[%s285_s8] sm:$0xff]  ;;  %v3353_v16 = vsub.s32 7, %v3309_v4  ;;  %v3366_v18 = vsub.s32 6, %v3309_v4  ;;  %v3403_v21 = vsub.s32 4, %v3309_v4  ;;  %s3249_s15 = smov 112   ;;  %s3250_s16 = smov 111  }
  0x13   : > { %3201 = vset.pattern.permute.xlu0 %v3236_v8  ;;  %v3329_v10 = vrot.slane %v3324_v9, %v3313_v5  ;;  %v3333_v11 = vrot.slane %v3324_v9, %v3316_v6  ;;  %v3339_v12 = vrot.slane %v3324_v9, %v3322_v7  ;;  %v3350_v15 = vrot.slane %v3324_v9, %v3342_v13  ;;  %v297_v55 = vld [vmem:[%s4981_s0] ss:$8 sm:$0xf0]  ;;  %v3012_v58 = vld [vmem:[%s4981_s0 + $0x1] ss:$8 sm:$0xf] }
  0x14   : > { %574 = vperm.xlu0 %3201, %v3303_v0   ;;  %v3361_v17 = vrot.slane %v3324_v9, %v3353_v16  ;;  %5078 = vst [vmem:[#allocation8_spill] sm:$0xff] %v3366_v18  ;;  %v3374_v19 = vrot.slane %v3324_v9, %v3366_v18  ;;  %5080 = vst [vmem:[#allocation10_spill] sm:$0xff] %v3403_v21  ;;  %v3410_v23 = vrot.slane %v3324_v9, %v3403_v21  ;;  %v3013_v59 = vld [vmem:[%s4981_s0 + $0x1] ss:$8 sm:$0xf0]  ;;  %vm2146_vm9 = vcmask 130048  }
  0x15   : > { %5073 = vst [vmem:[#allocation3_spill] sm:$0xff] %v3329_v10  ;;  %5074 = vst [vmem:[#allocation4_spill] sm:$0xff] %v3333_v11  ;;  %370 = vrot.lane.b32.xlu1 %v3329_v10, %s3237_s9  ;;  %v3470_v27 = vsub.s32 5, %v3309_v4  ;;  %v3576_v60 = vor.u32 %v297_v55, %v296_v54  ;;  %v3014_v62 = vld [vmem:[%s4981_s0 + $0x2] ss:$8 sm:$0xf] }
  0x16   : > { %5075 = vst [vmem:[#allocation5_spill] sm:$0xff] %v3339_v12  ;;  %5076 = vst [vmem:[#allocation6_spill] sm:$0xff] %v3350_v15  ;;  %v3015_v63 = vld [vmem:[%s4981_s0 + $0x2] ss:$8 sm:$0xf0]  ;;  %vm388_vm0 = vcmp.lt.s32.totalorder %v3566_v56, 17 }
  0x17   : > { %5077 = vst [vmem:[#allocation7_spill] sm:$0xff] %v3361_v17  ;;  %5079 = vst [vmem:[#allocation9_spill] sm:$0xff] %v3374_v19  ;;  %v3477_v28 = vrot.slane %v3324_v9, %v3470_v27  ;;  %v3016_v1 = vld [vmem:[%s4981_s0 + $0x3] ss:$8 sm:$0xf]  ;;  %v3599_v4 = vrot.slane %v3576_v60, %v3322_v7  ;;  %v3601_v8 = vor.u32 %v3015_v63, %v3014_v62  ;;  %vm515_vm1 = vcmp.lt.s32.totalorder %v3566_v56, 16 }
  0x18   : > { %376 = vrot.lane.b32.xlu0 %v3333_v11, %s3237_s9  ;;  %5081 = vst [vmem:[#allocation11_spill] sm:$0xff] %v3410_v23  ;;  %v3017_v2 = vld [vmem:[%s4981_s0 + $0x3] ss:$8 sm:$0xf0]  ;;  %vm641_vm2 = vcmp.lt.s32.totalorder %v3566_v56, 15  ;;  %vm767_vm3 = vcmp.lt.s32.totalorder %v3566_v56, 1 }
  0x19   : > { %3204 = vset.pattern.permute.xlu0 %v3238_v14  ;;  %372 = vrot.lane.b32.xlu1 %v3339_v12, %s3237_s9  ;;  %5082 = vst [vmem:[#allocation12_spill] sm:$0xff] %v3477_v28  ;;  %5090 = vst [vmem:[#allocation20_spill] sm:$0xff] %v3599_v4  ;;  %v3018_v14 = vld [vmem:[%s4981_s0 + $0x5] ss:$8 sm:$0xf]  ;;  %vm913_vm4 = vcmp.lt.s32.totalorder %v3566_v56, 127 }
  0x1a   : > { %v3020_v62 = vld [vmem:[%s4981_s0 + $0x6] ss:$8 sm:$0xf]  ;;  %vm1039_vm5 = vcmp.lt.s32.totalorder %v3566_v56, 113  ;;  %vm1165_vm6 = vcmp.lt.s32.totalorder %v3566_v56, 112  ;;  %vm1291_vm7 = vcmp.lt.s32.totalorder %v3566_v56, 111 }
  0x1b   : > { %v3021_v63 = vld [vmem:[%s4981_s0 + $0x6] ss:$8 sm:$0xf0]  ;;  %vm2549_vm10 = vcmask 261120   ;;  %s3173_s18 = smul.u32 192, %s5267_s25  ;;  %s3060_s22 = sshll.u32 %s5267_s25, 6 }
  0x1c   : > { %499 = vrot.lane.b32.xlu0 %v3329_v10, %s3239_s10 }
  0x1d   : > { %374 = vrot.lane.b32.xlu1 %v3350_v15, %s3237_s9  ;;  %s4938_s21 = scalar_lea.vmem %s4988_s7, %s3173_s18 }
  0x20   : > { %503 = vrot.lane.b32.xlu0 %v3350_v15, %s3239_s10 }
  0x21   : > { %384 = vrot.lane.b32.xlu1 %v3361_v17, %s3237_s9 }
  0x24   : > { %513 = vrot.lane.b32.xlu0 %v3361_v17, %s3239_s10 }
  0x25   : > { %501 = vrot.lane.b32.xlu1 %v3339_v12, %s3239_s10 }
  0x28   : > { %382 = vrot.lane.b32.xlu0 %v3374_v19, %s3237_s9 }
  0x29   : > { %505 = vrot.lane.b32.xlu1 %v3333_v11, %s3239_s10 }
  0x2c   : > { %625 = vrot.lane.b32.xlu0 %v3329_v10, %s3240_s11 }
  0x2d   : > { %700 = vperm.xlu1 %3202, %v3303_v0  }
  0x30   : > { %629 = vrot.lane.b32.xlu0 %v3350_v15, %s3240_s11 }
  0x31   : > { %511 = vrot.lane.b32.xlu1 %v3374_v19, %s3239_s10 }
  0x32   : > { %3203 = vset.pattern.permute.xlu1 %v3241_v20  ;;  %v3019_v20 = vld [vmem:[%s4981_s0 + $0x5] ss:$8 sm:$0xf0] }
  0x34   : > { %639 = vrot.lane.b32.xlu0 %v3361_v17, %s3240_s11 }
  0x35   : > { %627 = vrot.lane.b32.xlu1 %v3339_v12, %s3240_s11 }
  0x38   : > { %637 = vrot.lane.b32.xlu0 %v3374_v19, %s3240_s11 }
  0x39   : > { %631 = vrot.lane.b32.xlu1 %v3333_v11, %s3240_s11 }
  0x3c   : > { %753 = vrot.lane.b32.xlu0 %v3339_v12, %s3242_s12 }
  0x3d   : > { %826 = vperm.xlu1 %3203, %v3303_v0  }
  0x40   : > { %757 = vrot.lane.b32.xlu0 %v3333_v11, %s3242_s12 }
  0x41   : > { %751 = vrot.lane.b32.xlu1 %v3329_v10, %s3242_s12 }
  0x42   : > { %3205 = vset.pattern.permute.xlu1 %v3243_v22  ;;  %v3613_v22 = vrot.slane %v3576_v60, %v3342_v13 }
  0x44   : > { %878 = vperm.xlu0 %3204, %v3303_v0   ;;  %5092 = vst [vmem:[#allocation22_spill] sm:$0xff] %v3613_v22 }
  0x45   : > { %755 = vrot.lane.b32.xlu1 %v3350_v15, %s3242_s12 }
  0x48   : > { %378 = vrot.lane.b32.xlu0 %v3410_v23, %s3237_s9 }
  0x49   : > { %3209 = vset.pattern.permute.xlu0 %v3244_v24  ;;  %765 = vrot.lane.b32.xlu1 %v3361_v17, %s3242_s12 }
  0x4c   : > { %897 = vrot.lane.b32.xlu0 %v3329_v10, %s3245_s13 }
  0x4d   : > { %763 = vrot.lane.b32.xlu1 %v3374_v19, %s3242_s12 }
  0x50   : > { %901 = vrot.lane.b32.xlu0 %v3350_v15, %s3245_s13 }
  0x51   : > { %972 = vperm.xlu1 %3205, %v3303_v0  }
  0x54   : > { %905 = vrot.lane.b32.xlu0 %v3410_v23, %s3245_s13 }
  0x55   : > { %507 = vrot.lane.b32.xlu1 %v3410_v23, %s3239_s10 }
  0x56   : > { %3206 = vset.pattern.permute.xlu1 %v3246_v25  ;;  %v3620_v25 = vor.u32 %v3017_v2, %v3016_v1  ;;  %v3652_v2 = vrot.slane %v3576_v60, %v3353_v16 }
  0x58   : > { %911 = vrot.lane.b32.xlu0 %v3361_v17, %s3245_s13  ;;  %5100 = vst [vmem:[#allocation30_spill] sm:$0xff] %v3652_v2 }
  0x59   : > { %899 = vrot.lane.b32.xlu1 %v3339_v12, %s3245_s13 }
  0x5c   : > { %1023 = vrot.lane.b32.xlu0 %v3329_v10, %s3247_s14 }
  0x5d   : > { %903 = vrot.lane.b32.xlu1 %v3333_v11, %s3245_s13 }
  0x60   : > { %1027 = vrot.lane.b32.xlu0 %v3350_v15, %s3247_s14 }
  0x61   : > { %1098 = vperm.xlu1 %3206, %v3303_v0  }
  0x64   : > { %1031 = vrot.lane.b32.xlu0 %v3410_v23, %s3247_s14 }
  0x65   : > { %633 = vrot.lane.b32.xlu1 %v3410_v23, %s3240_s11 }
  0x66   : > { %3207 = vset.pattern.permute.xlu1 %v3248_v26  ;;  %v3624_v26 = vrot.slane %v3576_v60, %v3316_v6 }
  0x68   : > { %1037 = vrot.lane.b32.xlu0 %v3361_v17, %s3247_s14  ;;  %5094 = vst [vmem:[#allocation24_spill] sm:$0xff] %v3624_v26 }
  0x69   : > { %1025 = vrot.lane.b32.xlu1 %v3339_v12, %s3247_s14 }
  0x6c   : > { %1149 = vrot.lane.b32.xlu0 %v3329_v10, %s3249_s15 }
  0x6d   : > { %1029 = vrot.lane.b32.xlu1 %v3333_v11, %s3247_s14 }
  0x70   : > { %1153 = vrot.lane.b32.xlu0 %v3350_v15, %s3249_s15 }
  0x71   : > { %1224 = vperm.xlu1 %3207, %v3303_v0  }
  0x74   : > { %1157 = vrot.lane.b32.xlu0 %v3410_v23, %s3249_s15 }
  0x75   : > { %759 = vrot.lane.b32.xlu1 %v3410_v23, %s3242_s12 }
  0x76   : > { %3208 = vset.pattern.permute.xlu1 %v3244_v24  ;;  %v3617_v24 = vrot.slane %v3576_v60, %v3313_v5 }
  0x78   : > { %1163 = vrot.lane.b32.xlu0 %v3361_v17, %s3249_s15  ;;  %5093 = vst [vmem:[#allocation23_spill] sm:$0xff] %v3617_v24 }
  0x79   : > { %1151 = vrot.lane.b32.xlu1 %v3339_v12, %s3249_s15 }
  0x7c   : > { %1277 = vrot.lane.b32.xlu0 %v3339_v12, %s3250_s16  ;;  %v3690_v12 = vor.u32 %v3021_v63, %v3020_v62  ;;  %v3708_v62 = vrot.slane %v3620_v25, %v3313_v5  ;;  %v3712_v63 = vrot.slane %v3620_v25, %v3353_v16 }
  0x7d   : > { %1155 = vrot.lane.b32.xlu1 %v3333_v11, %s3249_s15 }
  0x7e   : > { %5112 = vst [vmem:[#allocation42_spill] sm:$0xff] %v3708_v62  ;;  %5113 = vst [vmem:[#allocation43_spill] sm:$0xff] %v3712_v63  ;;  %v3025_v63 = vld [vmem:[%s4981_s0 + $0x40] ss:$8 sm:$0xf0] }
  0x80   : > { %1281 = vrot.lane.b32.xlu0 %v3333_v11, %s3250_s16  ;;  %v3670_v11 = vrot.slane %v3601_v8, %v3342_v13 }
  0x81   : > { %1350 = vperm.xlu1 %3208, %v3303_v0   ;;  %v3586_v0 = vor.u32 %v3013_v59, %v3012_v58 }
  0x82   : > { %5104 = vst [vmem:[#allocation34_spill] sm:$0xff] %v3670_v11 }
  0x83   : > { %v3628_v54 = vrot.slane %v3586_v0, %v3322_v7  ;;  %v3632_v55 = vrot.slane %v3586_v0, %v3342_v13  ;;  %v3636_v58 = vrot.slane %v3586_v0, %v3316_v6  ;;  %v3648_v1 = vrot.slane %v3586_v0, %v3313_v5 }
  0x84   : > { %1289 = vrot.lane.b32.xlu0 %v3361_v17, %s3250_s16  ;;  %v3666_v17 = vrot.slane %v3601_v8, %v3322_v7 }
  0x85   : > { %1275 = vrot.lane.b32.xlu1 %v3329_v10, %s3250_s16  ;;  %5095 = vst [vmem:[#allocation25_spill] sm:$0xff] %v3628_v54  ;;  %5096 = vst [vmem:[#allocation26_spill] sm:$0xff] %v3632_v55  ;;  %v3674_v10 = vrot.slane %v3601_v8, %v3353_v16 }
  0x86   : > { %5097 = vst [vmem:[#allocation27_spill] sm:$0xff] %v3636_v58  ;;  %5099 = vst [vmem:[#allocation29_spill] sm:$0xff] %v3648_v1 }
  0x87   : > { %v3485_v29 = vpop.permute.xlu1 %370  ;;  %5103 = vst [vmem:[#allocation33_spill] sm:$0xff] %v3666_v17  ;;  %5105 = vst [vmem:[#allocation35_spill] sm:$0xff] %v3674_v10 }
  0x88   : > { %380 = vrot.lane.b32.xlu0 %v3477_v28, %s3237_s9 }
  0x89   : > { %1279 = vrot.lane.b32.xlu1 %v3350_v15, %s3250_s16 }
  0x8b   : > { %v3495_v31 = vpop.permute.xlu1 %372 }
  0x8c   : > { %1033 = vrot.lane.b32.xlu0 %v3477_v28, %s3247_s14 }
  0x8d   : > { %1283 = vrot.lane.b32.xlu1 %v3410_v23, %s3250_s16  ;;  %v3662_v23 = vrot.slane %v3601_v8, %v3313_v5 }
  0x8e   : > { %v3489_v30 = vpop.permute.xlu0 %448 }
  0x8f   : > { %5083 = vst [vmem:[#allocation13_spill] sm:$0xff] %v3489_v30  ;;  %v3505_v33 = vpop.permute.xlu1 %374  ;;  %5102 = vst [vmem:[#allocation32_spill] sm:$0xff] %v3662_v23 }
  0x90   : > { %1159 = vrot.lane.b32.xlu0 %v3477_v28, %s3249_s15 }
  0x91   : > { %907 = vrot.lane.b32.xlu1 %v3477_v28, %s3245_s13 }
  0x93   : > { %v3499_v32 = vpop.permute.xlu0 %574  ;;  %v3517_v36 = vpop.permute.xlu1 %384 }
  0x94   : > { %1285 = vrot.lane.b32.xlu0 %v3477_v28, %s3250_s16 }
  0x95   : > { %509 = vrot.lane.b32.xlu1 %v3477_v28, %s3239_s10 }
  0x97   : > { %v3507_v34 = vpop.permute.xlu0 %376  ;;  %v3525_v38 = vpop.permute.xlu1 %501 }
  0x98   : > { %1035 = vrot.lane.b32.xlu0 %v3374_v19, %s3247_s14 }
  0x99   : > { %635 = vrot.lane.b32.xlu1 %v3477_v28, %s3240_s11 }
  0x9b   : > { %v3513_v35 = vpop.permute.xlu0 %499  ;;  %v3533_v41 = vpop.permute.xlu1 %505 }
  0x9c   : > { %1287 = vrot.lane.b32.xlu0 %v3374_v19, %s3250_s16 }
  0x9d   : > { %761 = vrot.lane.b32.xlu1 %v3477_v28, %s3242_s12  ;;  %v3658_v28 = vor.u32 %v3019_v20, %v3018_v14  ;;  %v3680_v14 = vrot.slane %v3601_v8, %v3316_v6  ;;  %v3684_v20 = vrot.slane %v3620_v25, %v3322_v7 }
  0x9f   : > { %v3521_v37 = vpop.permute.xlu0 %503  ;;  %5107 = vst [vmem:[#allocation37_spill] sm:$0xff] %v3680_v14  ;;  %5108 = vst [vmem:[#allocation38_spill] sm:$0xff] %v3684_v20  ;;  %v3730_v62 = vrot.slane %v3658_v28, %v3313_v5 }
  0xa1   : > { %909 = vrot.lane.b32.xlu1 %v3374_v19, %s3245_s13  ;;  %5117 = vst [vmem:[#allocation47_spill] sm:$0xff] %v3730_v62  ;;  %v3750_v62 = vrot.slane %v3658_v28, %v3342_v13 }
  0xa3   : > { %v3527_v39 = vpop.permute.xlu0 %513  ;;  %5120 = vst [vmem:[#allocation50_spill] sm:$0xff] %v3750_v62  ;;  %v3775_v62 = vrot.slane %v3690_v12, %v3313_v5 }
  0xa5   : > { %1161 = vrot.lane.b32.xlu1 %v3374_v19, %s3249_s15  ;;  %v3656_v19 = vrot.slane %v3586_v0, %v3353_v16  ;;  %5124 = vst [vmem:[#allocation54_spill] sm:$0xff] %v3775_v62 }
  0xa7   : > { %v3531_v40 = vpop.permute.xlu0 %382  ;;  %5101 = vst [vmem:[#allocation31_spill] sm:$0xff] %v3656_v19 }
  0xab   : > { %v3535_v42 = vpop.permute.xlu0 %625 }
  0xac   : > { %v3537_v43 = vpop.permute.xlu1 %700 }
  0xad   : > { %5084 = vst [vmem:[#allocation14_spill] sm:$0xff] %v3537_v43  ;;  %v3704_v43 = vrot.slane %v3576_v60, %v3403_v21 }
  0xaf   : > { %v3539_v44 = vpop.permute.xlu0 %629  ;;  %5111 = vst [vmem:[#allocation41_spill] sm:$0xff] %v3704_v43  ;;  %v3726_v43 = vrot.slane %v3658_v28, %v3353_v16 }
  0xb0   : > { %v3541_v45 = vpop.permute.xlu1 %511 }
  0xb1   : > { %5116 = vst [vmem:[#allocation46_spill] sm:$0xff] %v3726_v43  ;;  %v3746_v43 = vrot.slane %v3658_v28, %v3322_v7 }
  0xb3   : > { %v3543_v46 = vpop.permute.xlu0 %639  ;;  %5119 = vst [vmem:[#allocation49_spill] sm:$0xff] %v3746_v43  ;;  %v3768_v43 = vrot.slane %v3690_v12, %v3353_v16 }
  0xb4   : > { %v3545_v47 = vpop.permute.xlu1 %627 }
  0xb5   : > { %5123 = vst [vmem:[#allocation53_spill] sm:$0xff] %v3768_v43  ;;  %v393_v43 = vsel %vm388_vm0, %v3505_v33, %v3507_v34 }
  0xb7   : > { %v3547_v48 = vpop.permute.xlu0 %637 }
  0xb8   : > { %5085 = vst [vmem:[#allocation15_spill] sm:$0xff] %v3547_v48  ;;  %v3549_v49 = vpop.permute.xlu1 %631 }
  0xbb   : > { %v3551_v50 = vpop.permute.xlu0 %753 }
  0xbc   : > { %v3553_v51 = vpop.permute.xlu1 %826 }
  0xbd   : > { %5086 = vst [vmem:[#allocation16_spill] sm:$0xff] %v3553_v51  ;;  %v3023_v51 = vld [vmem:[%s4981_s0 + $0x7] ss:$8 sm:$0xf0] }
  0xbf   : > { %v3555_v52 = vpop.permute.xlu0 %757 }
  0xc0   : > { %5087 = vst [vmem:[#allocation17_spill] sm:$0xff] %v3555_v52  ;;  %v3557_v53 = vpop.permute.xlu1 %751  ;;  %v396_v52 = vsel %vm388_vm0, %v3517_v36, %v3485_v29 }
  0xc3   : > { %v3568_v57 = vpop.permute.xlu0 %878 }
  0xc4   : > { %5088 = vst [vmem:[#allocation18_spill] sm:$0xff] %v3568_v57  ;;  %v3578_v61 = vpop.permute.xlu1 %755  ;;  %v3688_v57 = vrot.slane %v3620_v25, %v3342_v13 }
  0xc6   : > { %5109 = vst [vmem:[#allocation39_spill] sm:$0xff] %v3688_v57 }
  0xc7   : > { %v3594_v3 = vpop.permute.xlu0 %378 }
  0xc8   : > { %5089 = vst [vmem:[#allocation19_spill] sm:$0xff] %v3594_v3  ;;  %v3603_v9 = vpop.permute.xlu1 %765  ;;  %v3700_v3 = vrot.slane %v3620_v25, %v3316_v6 }
  0xc9   : > { %5091 = vst [vmem:[#allocation21_spill] sm:$0xff] %v3603_v9 }
  0xca   : > { %5110 = vst [vmem:[#allocation40_spill] sm:$0xff] %v3700_v3  ;;  %v3722_v3 = vrot.slane %v3586_v0, %v3403_v21 }
  0xcb   : > { %v3638_v59 = vpop.permute.xlu0 %897 }
  0xcc   : > { %5098 = vst [vmem:[#allocation28_spill] sm:$0xff] %v3638_v59  ;;  %v3676_v15 = vpop.permute.xlu1 %763  ;;  %v3022_v59 = vld [vmem:[%s4981_s0 + $0x7] ss:$8 sm:$0xf]  ;;  %5115 = vst [vmem:[#allocation45_spill] sm:$0xff] %v3722_v3  ;;  %v394_v3 = vsel %vm388_vm0, %v3495_v31, %v3505_v33  ;;  %v3806_v33 = vrot.slane %v3620_v25, %v3403_v21 }
  0xcd   : > { %5106 = vst [vmem:[#allocation36_spill] sm:$0xff] %v3676_v15  ;;  %v395_v15 = vsel %vm388_vm0, %v3485_v29, %v3495_v31  ;;  %v3752_v20 = vor.u32 %v3023_v51, %v3022_v59  ;;  %v3760_v31 = vrot.slane %v3658_v28, %v3316_v6  ;;  %v3779_v29 = vrot.slane %v3690_v12, %v3322_v7 }
  0xce   : > { %v439_v51 = vmul.f32 %v3599_v4, %v395_v15  ;;  %v522_v15 = vsel %vm515_vm1, %v3513_v35, %v3525_v38  ;;  %v3794_v4 = vrot.slane %v3690_v12, %v3342_v13  ;;  %5129 = vst [vmem:[#allocation59_spill] sm:$0xff] %v3806_v33 }
  0xcf   : > { %v3714_v57 = vpop.permute.xlu0 %901  ;;  %5121 = vst [vmem:[#allocation51_spill] sm:$0xff] %v3760_v31  ;;  %5125 = vst [vmem:[#allocation55_spill] sm:$0xff] %v3779_v29  ;;  %v438_v29 = vmul.f32 %v3617_v24, %v396_v52  ;;  %v3818_v52 = vrot.slane %v3752_v20, %v3322_v7  ;;  %v3822_v24 = vrot.slane %v3752_v20, %v3342_v13 }
  0xd0   : > { %5114 = vst [vmem:[#allocation44_spill] sm:$0xff] %v3714_v57  ;;  %v3024_v57 = vld [vmem:[%s4981_s0 + $0x40] ss:$8 sm:$0xf]  ;;  %v3742_v9 = vpop.permute.xlu1 %972  ;;  %5127 = vst [vmem:[#allocation57_spill] sm:$0xff] %v3794_v4  ;;  %v458_v33 = vrot.slane %v439_v51, %v3313_v5  ;;  %v566_v4 = vmul.f32 %v3628_v54, %v522_v15  ;;  %v521_v15 = vsel %vm515_vm1, %v3525_v38, %v3521_v37 }
  0xd1   : > { %5118 = vst [vmem:[#allocation48_spill] sm:$0xff] %v3742_v9  ;;  %v3764_v9 = vrot.slane %v3601_v8, %v3403_v21  ;;  %v3781_v31 = vor.u32 %v3025_v63, %v3024_v57  ;;  %v3810_v63 = vrot.slane %v3752_v20, %v3353_v16  ;;  %5132 = vst [vmem:[#allocation62_spill] sm:$0xff] %v3818_v52 }
  0xd2   : > { %5133 = vst [vmem:[#allocation63_spill] sm:$0xff] %v3822_v24  ;;  %v454_v51 = vrot.slane %v438_v29, %v3313_v5  ;;  %v3872_v38 = vrot.slane %v3690_v12, %v3403_v21  ;;  %v484_v54 = vmul.f32 %v458_v33, %v3489_v30 }
  0xd3   : > { %5122 = vst [vmem:[#allocation52_spill] sm:$0xff] %v3764_v9  ;;  %v3771_v59 = vpop.permute.xlu0 %905  ;;  %5126 = vst [vmem:[#allocation56_spill] sm:$0xff] %v3781_v31  ;;  %v440_v9 = vmul.f32 %v3613_v22, %v394_v3  ;;  %v3802_v3 = vrot.slane %v3690_v12, %v3316_v6  ;;  %v3814_v22 = vrot.slane %v3752_v20, %v3313_v5 }
  0xd4   : > { %v3798_v57 = vpop.permute.xlu1 %507  ;;  %5130 = vst [vmem:[#allocation60_spill] sm:$0xff] %v3810_v63  ;;  %v441_v63 = vmul.f32 %v3624_v26, %v393_v43  ;;  %v3840_v24 = vrot.slane %v3781_v31, %v3353_v16  ;;  %v3848_v43 = vrot.slane %v3576_v60, %v3366_v18  ;;  %v3860_v16 = vrot.slane %v3781_v31, %v3322_v7 }
  0xd5   : > { %5128 = vst [vmem:[#allocation58_spill] sm:$0xff] %v3802_v3  ;;  %5131 = vst [vmem:[#allocation61_spill] sm:$0xff] %v3814_v22  ;;  %v3826_v3 = vrot.slane %v3752_v20, %v3316_v6  ;;  %v3835_v22 = vrot.slane %v3781_v31, %v3313_v5  ;;  %v462_v52 = vrot.slane %v440_v9, %v3313_v5 }
  0xd6   : > { %5136 = vst [vmem:[#allocation66_spill] sm:$0xff] %v3840_v24  ;;  %5138 = vst [vmem:[#allocation68_spill] sm:$0xff] %v3848_v43  ;;  %v3864_v26 = vrot.slane %v3781_v31, %v3342_v13  ;;  %v3876_v29 = vrot.slane %v3781_v31, %v3316_v6  ;;  %v3880_v7 = vrot.slane %v3752_v20, %v3403_v21 }
  0xd7   : > { %5134 = vst [vmem:[#allocation64_spill] sm:$0xff] %v3826_v3  ;;  %v3831_v62 = vpop.permute.xlu0 %911  ;;  %v3844_v3 = vrot.slane %v3576_v60, %v3470_v27  ;;  %v520_v60 = vsel %vm515_vm1, %v3521_v37, %v3533_v41  ;;  %5139 = vst [vmem:[#allocation69_spill] sm:$0xff] %v3872_v38  ;;  %v466_v13 = vrot.slane %v441_v63, %v3313_v5 }
  0xd8   : > { %5135 = vst [vmem:[#allocation65_spill] sm:$0xff] %v3831_v62  ;;  %v3856_v9 = vpop.permute.xlu1 %899  ;;  %5140 = vst [vmem:[#allocation70_spill] sm:$0xff] %v3876_v29  ;;  %v584_v43 = vrot.slane %v566_v4, %v3313_v5  ;;  %v3889_v37 = vrot.slane %v3658_v28, %v3403_v21  ;;  %v485_v38 = vmul.f32 %v462_v52, %v3489_v30 }
  0xd9   : > { %5137 = vst [vmem:[#allocation67_spill] sm:$0xff] %v3844_v3  ;;  %5141 = vst [vmem:[#allocation71_spill] sm:$0xff] %v3880_v7  ;;  %v567_v6 = vmul.f32 %v3632_v55, %v521_v15  ;;  %v3895_v29 = vrot.slane %v3586_v0, %v3470_v27  ;;  %v3899_v63 = vrot.slane %v3586_v0, %v3366_v18 }
  0xda   : > { %v3902_v4 = vmul.f32 %v454_v51, %v3489_v30  ;;  %v568_v33 = vmul.f32 %v3636_v58, %v520_v60  ;;  %v3909_v52 = vrot.slane %v3690_v12, %v3470_v27  ;;  %v3913_v15 = vrot.slane %v3690_v12, %v3366_v18 }
  0xdb   : > { %v3885_v3 = vpop.permute.xlu0 %1023  ;;  %5142 = vst [vmem:[#allocation72_spill] sm:$0xff] %v3895_v29  ;;  %5143 = vst [vmem:[#allocation73_spill] sm:$0xff] %v3899_v63  ;;  %v523_v0 = vsel %vm515_vm1, %v3527_v39, %v3513_v35  ;;  %v3921_v51 = vrot.slane %v3601_v8, %v3470_v27  ;;  %v3925_v60 = vrot.slane %v3601_v8, %v3366_v18 }
  0xdc   : > { %v3905_v7 = vpop.permute.xlu1 %903  ;;  %5144 = vst [vmem:[#allocation74_spill] sm:$0xff] %v3909_v52  ;;  %5145 = vst [vmem:[#allocation75_spill] sm:$0xff] %v3913_v15  ;;  %v3929_v58 = vrot.slane %v3781_v31, %v3470_v27  ;;  %v486_v12 = vmul.f32 %v466_v13, %v3489_v30  ;;  %v610_v55 = vmul.f32 %v584_v43, %v3499_v32 }
  0xdd   : > { %5146 = vst [vmem:[#allocation76_spill] sm:$0xff] %v3921_v51  ;;  %5147 = vst [vmem:[#allocation77_spill] sm:$0xff] %v3925_v60  ;;  %v516_v35 = vsel %vm515_vm1, %v3541_v45, %v3527_v39  ;;  %v3941_v15 = vrot.slane %v3781_v31, %v3366_v18  ;;  %v588_v8 = vrot.slane %v567_v6, %v3313_v5 }
  0xde   : > { %5148 = vst [vmem:[#allocation78_spill] sm:$0xff] %v3929_v58  ;;  %v649_v13 = vsel %vm641_vm2, %v3543_v46, %v3535_v42  ;;  %v3950_v43 = vrot.slane %v3620_v25, %v3470_v27  ;;  %v3954_v39 = vrot.slane %v3620_v25, %v3366_v18  ;;  %v592_v58 = vrot.slane %v568_v33, %v3313_v5 }
  0xdf   : > { %v3937_v21 = vpop.permute.xlu0 %1027  ;;  %5149 = vst [vmem:[#allocation79_spill] sm:$0xff] %v3941_v15  ;;  %v565_v31 = vmul.f32 %v3648_v1, %v523_v0  ;;  %v647_v6 = vsel %vm641_vm2, %v3545_v47, %v3539_v44  ;;  %v648_v15 = vsel %vm641_vm2, %v3535_v42, %v3545_v47  ;;  %v389_v25 = vsel %vm388_vm0, %v3531_v40, %v3517_v36 }
  0xe0   : > { %5150 = vst [vmem:[#allocation80_spill] sm:$0xff] %v3950_v43  ;;  %5151 = vst [vmem:[#allocation81_spill] sm:$0xff] %v3954_v39  ;;  %v3966_v52 = vpop.permute.xlu1 %1098  ;;  %v572_v33 = vmul.f32 %v3656_v19, %v516_v35  ;;  %v642_v0 = vsel %vm641_vm2, %v3547_v48, %v3543_v46  ;;  %v646_v1 = vsel %vm641_vm2, %v3539_v44, %v3549_v49 }
  0xe1   : > { %v618_v42 = vadd.f32 %v610_v55, %v484_v54  ;;  %v691_v47 = vmul.f32 %v3662_v23, %v649_v13  ;;  %v3986_v36 = vrot.slane %v3658_v28, %v3470_v27  ;;  %v3990_v35 = vrot.slane %v3658_v28, %v3366_v18 }
  0xe2   : > { %v611_v46 = vmul.f32 %v588_v8, %v3499_v32  ;;  %v692_v19 = vmul.f32 %v3666_v17, %v648_v15  ;;  %v693_v43 = vmul.f32 %v3670_v11, %v647_v6  ;;  %v774_v44 = vsel %vm767_vm3, %v3557_v53, %v3551_v50  ;;  %v5154_v11 = vld [vmem:[#allocation17_spill] sm:$0xff] }
  0xe3   : > { %v3982_v39 = vpop.permute.xlu0 %1031  ;;  %5152 = vst [vmem:[#allocation82_spill] sm:$0xff] %v3986_v36  ;;  %5153 = vst [vmem:[#allocation83_spill] sm:$0xff] %v3990_v35  ;;  %v445_v54 = vmul.f32 %v3652_v2, %v389_v25  ;;  %v698_v55 = vmul.f32 %v3674_v10, %v642_v0  ;;  %v694_v13 = vmul.f32 %v3680_v14, %v646_v1  ;;  %v5155_v0 = vld [vmem:[#allocation38_spill] sm:$0xff]  ;;  %v5159_v36 = vld [vmem:[#allocation40_spill] sm:$0xff] }
  0xe4   : > { %v773_v28 = vsel %vm767_vm3, %v3551_v50, %v3578_v61  ;;  %v4006_v8 = vpop.permute.xlu1 %633  ;;  %v612_v15 = vmul.f32 %v592_v58, %v3499_v32  ;;  %v580_v6 = vrot.slane %v565_v31, %v3313_v5  ;;  %v608_v23 = vrot.slane %v572_v33, %v3313_v5  ;;  %v5156_v50 = vld [vmem:[#allocation21_spill] sm:$0xff]  ;;  %v5157_v31 = vld [vmem:[#allocation36_spill] sm:$0xff] }
  0xe5   : > { %v772_v25 = vsel %vm767_vm3, %v3578_v61, %v5154_v11  ;;  %v706_v1 = vrot.slane %v691_v47, %v3313_v5  ;;  %v818_v10 = vmul.f32 %v5155_v0, %v774_v44  ;;  %v775_v58 = vsel %vm767_vm3, %v5156_v50, %v3557_v53  ;;  %v5158_v47 = vld [vmem:[#allocation39_spill] sm:$0xff] }
  0xe6   : > { %v768_v33 = vsel %vm767_vm3, %v5157_v31, %v5156_v50  ;;  %v619_v14 = vadd.f32 %v611_v46, %v485_v38  ;;  %v710_v61 = vrot.slane %v692_v19, %v3313_v5  ;;  %v714_v17 = vrot.slane %v693_v43, %v3313_v5  ;;  %v5160_v38 = vld [vmem:[#allocation42_spill] sm:$0xff]  ;;  %v5161_v19 = vld [vmem:[#allocation43_spill] sm:$0xff] }
  0xe7   : > { %v4026_v2 = vpop.permute.xlu0 %1037  ;;  %v819_v35 = vmul.f32 %v5158_v47, %v773_v28  ;;  %v482_v44 = vrot.slane %v445_v54, %v3313_v5  ;;  %v734_v0 = vrot.slane %v698_v55, %v3313_v5  ;;  %v718_v53 = vrot.slane %v694_v13, %v3313_v5  ;;  %v5162_v28 = vld [vmem:[#allocation14_spill] sm:$0xff] }
  0xe8   : > { %v820_v18 = vmul.f32 %v5159_v36, %v772_v25  ;;  %v4035_v60 = vpop.permute.xlu1 %1025  ;;  %v620_v50 = vadd.f32 %v612_v15, %v486_v12  ;;  %v609_v31 = vmul.f32 %v580_v6, %v3499_v32  ;;  %v817_v46 = vmul.f32 %v5160_v38, %v775_v58  ;;  %v5163_v25 = vld [vmem:[#allocation19_spill] sm:$0xff] }
  0xe9   : > { %v824_v51 = vmul.f32 %v5161_v19, %v768_v33  ;;  %v616_v43 = vmul.f32 %v608_v23, %v3499_v32  ;;  %v735_v47 = vmul.f32 %v706_v1, %v5162_v28  ;;  %v836_v54 = vrot.slane %v818_v10, %v3313_v5  ;;  %v5164_v19 = vld [vmem:[#allocation45_spill] sm:$0xff] }
  0xea   : > { %v519_v55 = vsel %vm515_vm1, %v3533_v41, %v3798_v57  ;;  %v736_v12 = vmul.f32 %v710_v61, %v5162_v28  ;;  %v737_v15 = vmul.f32 %v714_v17, %v5162_v28  ;;  %v840_v6 = vrot.slane %v819_v35, %v3313_v5 }
  0xeb   : > { %v4047_v13 = vpop.permute.xlu0 %1149  ;;  %v392_v23 = vsel %vm388_vm0, %v3507_v34, %v5163_v25  ;;  %v490_v10 = vmul.f32 %v482_v44, %v3489_v30  ;;  %v742_v1 = vmul.f32 %v734_v0, %v5162_v28  ;;  %v738_v58 = vmul.f32 %v718_v53, %v5162_v28  ;;  %v5165_v34 = vld [vmem:[#allocation16_spill] sm:$0xff]  ;;  %v5166_v44 = vld [vmem:[#allocation41_spill] sm:$0xff] }
  0xec   : > { %v844_v41 = vrot.slane %v820_v18, %v3313_v5  ;;  %v4060_v33 = vpop.permute.xlu1 %1029  ;;  %v617_v61 = vadd.f32 %v609_v31, %v3902_v4  ;;  %v832_v17 = vrot.slane %v817_v46, %v3313_v5  ;;  %v860_v35 = vrot.slane %v824_v51, %v3313_v5 }
  0xed   : > { %v569_v38 = vmul.f32 %v5164_v19, %v519_v55  ;;  %v624_v36 = vadd.f32 %v616_v43, %v490_v10  ;;  %v862_v48 = vmul.f32 %v836_v54, %v5165_v34  ;;  %v442_v63 = vmul.f32 %v5166_v44, %v392_v23  ;;  %v5168_v54 = vld [vmem:[#allocation28_spill] sm:$0xff]  ;;  %v5171_v10 = vld [vmem:[#allocation6_spill] sm:$0xff] }
  0xee   : > { %v4072_v18 = vrot.slane %v3752_v20, %v3470_v27  ;;  %v743_v53 = vadd.f32 %v735_v47, %v617_v61  ;;  %v744_v29 = vadd.f32 %v736_v12, %v618_v42  ;;  %v745_v4 = vadd.f32 %v737_v15, %v619_v14  ;;  %v5169_v12 = vld [vmem:[#allocation5_spill] sm:$0xff]  ;;  %v5170_v15 = vld [vmem:[#allocation18_spill] sm:$0xff]  ;;  %v5176_v44 = vld [vmem:[#allocation4_spill] sm:$0xff] }
  0xef   : > { %v4068_v0 = vpop.permute.xlu0 %1153  ;;  %v863_v31 = vmul.f32 %v840_v6, %v5165_v34  ;;  %v750_v51 = vadd.f32 %v742_v1, %v624_v36  ;;  %v746_v46 = vadd.f32 %v738_v58, %v620_v50  ;;  %v864_v43 = vmul.f32 %v844_v41, %v5165_v34 }
  0xf0   : > { %5167 = vst [vmem:[#allocation17_spill] sm:$0xff] %v4072_v18  ;;  %v921_v55 = vsel %vm913_vm4, %v3831_v62, %v5168_v54  ;;  %v4081_v23 = vpop.permute.xlu1 %1224  ;;  %v861_v27 = vmul.f32 %v832_v17, %v5165_v34  ;;  %v868_v42 = vmul.f32 %v860_v35, %v5165_v34  ;;  %v596_v14 = vrot.slane %v569_v38, %v3313_v5  ;;  %v5172_v38 = vld [vmem:[#allocation46_spill] sm:$0xff]  ;;  %v5173_v17 = vld [vmem:[#allocation44_spill] sm:$0xff]  ;;  %v5174_v35 = vld [vmem:[#allocation3_spill] sm:$0xff] }
  0xf1   : > { %v920_v36 = vsel %vm913_vm4, %v5168_v54, %v3856_v9  ;;  %v870_v47 = vadd.f32 %v862_v48, %v744_v29  ;;  %v470_v50 = vrot.slane %v442_v63, %v3313_v5  ;;  %v882_v6 = vmul.f32 %v5170_v15, %v5169_v12  ;;  %v5175_v12 = vld [vmem:[#allocation47_spill] sm:$0xff] }
  0xf2   : > { %v883_v1 = vmul.f32 %v5170_v15, %v5171_v10  ;;  %v871_v41 = vadd.f32 %v863_v31, %v745_v4  ;;  %v970_v61 = vmul.f32 %v5172_v38, %v921_v55  ;;  %v919_v48 = vsel %vm913_vm4, %v3856_v9, %v5173_v17  ;;  %v5182_v62 = vld [vmem:[#allocation51_spill] sm:$0xff] }
  0xf3   : > { %v4095_v58 = vpop.permute.xlu0 %1157  ;;  %v918_v29 = vsel %vm913_vm4, %v5173_v17, %v3905_v7  ;;  %v872_v63 = vadd.f32 %v864_v43, %v746_v46  ;;  %v881_v54 = vmul.f32 %v5170_v15, %v5174_v35  ;;  %v963_v10 = vmul.f32 %v5175_v12, %v920_v36  ;;  %v5178_v46 = vld [vmem:[#allocation7_spill] sm:$0xff]  ;;  %v5179_v35 = vld [vmem:[#allocation49_spill] sm:$0xff]  ;;  %v5180_v36 = vld [vmem:[#allocation50_spill] sm:$0xff] }
  0xf4   : > { %v884_v4 = vmul.f32 %v5170_v15, %v5176_v44  ;;  %v4112_v31 = vpop.permute.xlu1 %759  ;;  %v869_v55 = vadd.f32 %v861_v27, %v743_v53  ;;  %v876_v38 = vadd.f32 %v868_v42, %v750_v51  ;;  %v613_v9 = vmul.f32 %v596_v14, %v3499_v32  ;;  %v5181_v44 = vld [vmem:[#allocation11_spill] sm:$0xff] }
  0xf5   : > { %5177 = vst [vmem:[#allocation21_spill] sm:$0xff] %v4112_v31  ;;  %v917_v17 = vsel %vm913_vm4, %v3905_v7, %v3771_v59  ;;  %v888_v43 = vmul.f32 %v5170_v15, %v5178_v46  ;;  %v964_v19 = vmul.f32 %v5179_v35, %v919_v48  ;;  %v965_v12 = vmul.f32 %v5180_v36, %v918_v29  ;;  %v5189_v36 = vld [vmem:[#allocation61_spill] sm:$0xff] }
  0xf6   : > { %v4127_v53 = vmul.f32 %v5170_v15, %v5181_v44  ;;  %v487_v51 = vmul.f32 %v470_v50, %v3489_v30  ;;  %v1006_v27 = vrot.slane %v970_v61, %v3313_v5  ;;  %v890_v42 = vadd.f32 %v882_v6, %v870_v47 }
  0xf7   : > { %v4123_v18 = vpop.permute.xlu0 %1163  ;;  %v891_v14 = vadd.f32 %v883_v1, %v871_v41  ;;  %v978_v7 = vrot.slane %v963_v10, %v3313_v5  ;;  %v966_v46 = vmul.f32 %v5182_v62, %v917_v17  ;;  %v645_v48 = vsel %vm641_vm2, %v3549_v49, %v4006_v8  ;;  %v5188_v62 = vld [vmem:[#allocation58_spill] sm:$0xff] }
  0xf8   : > { %v1046_v29 = vsel %vm1039_vm5, %v3885_v3, %v4035_v60  ;;  %v1152_v44 = vpop.permute.xlu1 %1151  ;;  %v4141_v50 = vadd.f32 %v613_v9, %v487_v51  ;;  %v896_v61 = vadd.f32 %v888_v43, %v876_v38  ;;  %v889_v47 = vadd.f32 %v881_v54, %v869_v55  ;;  %v5183_v38 = vld [vmem:[#allocation52_spill] sm:$0xff]  ;;  %v5184_v54 = vld [vmem:[#allocation54_spill] sm:$0xff] }
  0xf9   : > { %v892_v6 = vadd.f32 %v884_v4, %v872_v63  ;;  %v982_v1 = vrot.slane %v964_v19, %v3313_v5  ;;  %v986_v41 = vrot.slane %v965_v12, %v3313_v5  ;;  %v1045_v49 = vsel %vm1039_vm5, %v4035_v60, %v3937_v21  ;;  %v5185_v4 = vld [vmem:[#allocation48_spill] sm:$0xff] }
  0xfa   : > { %v1044_v10 = vsel %vm1039_vm5, %v3937_v21, %v4060_v33  ;;  %v695_v63 = vmul.f32 %v5183_v38, %v645_v48  ;;  %v1089_v19 = vmul.f32 %v5184_v54, %v1046_v29  ;;  %v1043_v12 = vsel %vm1039_vm5, %v4060_v33, %v3982_v39  ;;  %v5186_v48 = vld [vmem:[#allocation55_spill] sm:$0xff]  ;;  %v5187_v38 = vld [vmem:[#allocation57_spill] sm:$0xff] }
  0xfb   : > { %v4153_v17 = vpop.permute.xlu0 %1277  ;;  %v1172_v60 = vsel %vm1165_vm6, %v4047_v13, %v1152_v44  ;;  %v1014_v55 = vmul.f32 %v1006_v27, %v5185_v4  ;;  %v1007_v21 = vmul.f32 %v978_v7, %v5185_v4  ;;  %v990_v9 = vrot.slane %v966_v46, %v3313_v5 }
  0xfc   : > { %v1047_v43 = vsel %vm1039_vm5, %v4026_v2, %v3885_v3  ;;  %v1156_v51 = vpop.permute.xlu1 %1155  ;;  %v1090_v29 = vmul.f32 %v5186_v48, %v1045_v49  ;;  %v1091_v33 = vmul.f32 %v5187_v38, %v1044_v10  ;;  %v771_v54 = vsel %vm767_vm3, %v5154_v11, %v4112_v31  ;;  %v5190_v38 = vld [vmem:[#allocation53_spill] sm:$0xff] }
  0xfd   : > { %v1171_v27 = vsel %vm1165_vm6, %v1152_v44, %v4068_v0  ;;  %v1008_v7 = vmul.f32 %v982_v1, %v5185_v4  ;;  %v1009_v46 = vmul.f32 %v986_v41, %v5185_v4  ;;  %v1092_v3 = vmul.f32 %v5188_v62, %v1043_v12  ;;  %v5191_v41 = vld [vmem:[#allocation59_spill] sm:$0xff]  ;;  %v5192_v12 = vld [vmem:[#allocation62_spill] sm:$0xff] }
  0xfe   : > { %v1215_v35 = vmul.f32 %v5189_v36, %v1172_v60  ;;  %v722_v10 = vrot.slane %v695_v63, %v3313_v5  ;;  %v1096_v48 = vmul.f32 %v5190_v38, %v1047_v43  ;;  %v1104_v11 = vrot.slane %v1089_v19, %v3313_v5 }
  0xff   : > { %v4185_v49 = vpop.permute.xlu0 %1281  ;;  %v1170_v44 = vsel %vm1165_vm6, %v4068_v0, %v1156_v51  ;;  %v4193_v31 = vadd.f32 %v1014_v55, %v896_v61  ;;  %v1015_v1 = vadd.f32 %v1007_v21, %v889_v47  ;;  %v821_v30 = vmul.f32 %v5191_v41, %v771_v54  ;;  %v5193_v54 = vld [vmem:[#allocation63_spill] sm:$0xff] }
 0x100   : > { %v1216_v62 = vmul.f32 %v5192_v12, %v1171_v27  ;;  %v4197_v60 = vpop.permute.xlu1 %1350  ;;  %v1010_v36 = vmul.f32 %v990_v9, %v5185_v4  ;;  %v1108_v63 = vrot.slane %v1090_v29, %v3313_v5  ;;  %v1112_v43 = vrot.slane %v1091_v33, %v3313_v5 }
 0x101   : > { %v1169_v19 = vsel %vm1165_vm6, %v1156_v51, %v4095_v58  ;;  %v1016_v0 = vadd.f32 %v1008_v7, %v890_v42  ;;  %v1116_v61 = vrot.slane %v1092_v3, %v3313_v5  ;;  %v1230_v47 = vrot.slane %v1215_v35, %v3313_v5  ;;  %v5194_v51 = vld [vmem:[#allocation64_spill] sm:$0xff] }
 0x102   : > { %v1217_v55 = vmul.f32 %v5193_v54, %v1170_v44  ;;  %v1017_v27 = vadd.f32 %v1009_v46, %v891_v14  ;;  %v739_v9 = vmul.f32 %v722_v10, %v5162_v28  ;;  %v1132_v29 = vrot.slane %v1096_v48, %v3313_v5 }
 0x103   : > { %v4208_v21 = vpop.permute.xlu0 %1289  ;;  %v1133_v33 = vmul.f32 %v1104_v11, %v3966_v52  ;;  %v848_v38 = vrot.slane %v821_v30, %v3313_v5  ;;  %v1173_v42 = vsel %vm1165_vm6, %v4123_v18, %v4047_v13  ;;  %v1234_v35 = vrot.slane %v1216_v62, %v3313_v5 }
 0x104   : > { %v1218_v7 = vmul.f32 %v5194_v51, %v1169_v19  ;;  %v1276_v3 = vpop.permute.xlu1 %1275  ;;  %v1018_v44 = vadd.f32 %v1010_v36, %v892_v6  ;;  %v1134_v14 = vmul.f32 %v1108_v63, %v3966_v52  ;;  %v1135_v46 = vmul.f32 %v1112_v43, %v3966_v52  ;;  %v5195_v63 = vld [vmem:[#allocation60_spill] sm:$0xff] }
 0x105   : > { %v1298_v48 = vsel %vm1291_vm7, %v1276_v3, %v4153_v17  ;;  %v1136_v30 = vmul.f32 %v1116_v61, %v3966_v52  ;;  %v1259_v10 = vmul.f32 %v1230_v47, %v4081_v23  ;;  %v1238_v13 = vrot.slane %v1217_v55, %v3313_v5 }
 0x106   : > { %v1341_v62 = vmul.f32 %v3835_v22, %v1298_v48  ;;  %v747_v19 = vadd.f32 %v739_v9, %v4141_v50  ;;  %v4231_v36 = vmul.f32 %v1132_v29, %v3966_v52  ;;  %v1141_v6 = vadd.f32 %v1133_v33, %v1015_v1 }
 0x107   : > { %v381_v11 = vpop.permute.xlu0 %380  ;;  %v1222_v43 = vmul.f32 %v5195_v63, %v1173_v42  ;;  %v865_v41 = vmul.f32 %v848_v38, %v5165_v34  ;;  %v1260_v51 = vmul.f32 %v1234_v35, %v4081_v23  ;;  %v1242_v61 = vrot.slane %v1218_v7, %v3313_v5 }
 0x108   : > { %v1356_v47 = vrot.slane %v1341_v62, %v3313_v5  ;;  %v1280_v55 = vpop.permute.xlu1 %1279  ;;  %v1142_v54 = vadd.f32 %v1134_v14, %v1016_v0  ;;  %v1143_v48 = vadd.f32 %v1135_v46, %v1017_v27  ;;  %v1144_v9 = vadd.f32 %v1136_v30, %v1018_v44 }
 0x109   : > { %v1296_v50 = vsel %vm1291_vm7, %v1280_v55, %v4185_v49  ;;  %v1297_v1 = vsel %vm1291_vm7, %v4153_v17, %v1280_v55  ;;  %v1267_v29 = vadd.f32 %v1259_v10, %v1141_v6  ;;  %v1261_v38 = vmul.f32 %v1238_v13, %v4081_v23 }
 0x10a   : > { %v1385_v33 = vmul.f32 %v1356_v47, %v4197_v60  ;;  %v1258_v35 = vrot.slane %v1222_v43, %v3313_v5  ;;  %v1299_v0 = vsel %vm1291_vm7, %v4208_v21, %v1276_v3  ;;  %v1342_v27 = vmul.f32 %v3860_v16, %v1297_v1 }
 0x10b   : > { %v4246_v42 = vpop.permute.xlu0 %1033  ;;  %v1343_v7 = vmul.f32 %v3864_v26, %v1296_v50  ;;  %v873_v14 = vadd.f32 %v865_v41, %v747_v19  ;;  %v1268_v17 = vadd.f32 %v1260_v51, %v1142_v54  ;;  %v1262_v44 = vmul.f32 %v1242_v61, %v4081_v23  ;;  %v5196_v19 = vld [vmem:[#allocation70_spill] sm:$0xff] }
 0x10c   : > { %v1393_v46 = vadd.f32 %v1385_v33, %v1267_v29  ;;  %v4255_v30 = vpop.permute.xlu1 %1283  ;;  %v1360_v10 = vrot.slane %v1342_v27, %v3313_v5  ;;  %v1042_v3 = vsel %vm1039_vm5, %v3982_v39, %v4246_v42  ;;  %v1269_v54 = vadd.f32 %v1261_v38, %v1143_v48  ;;  %v5197_v48 = vld [vmem:[#allocation69_spill] sm:$0xff]  ;;  %v5198_v29 = vld [vmem:[#allocation71_spill] sm:$0xff] }
 0x10d   : > { %v1364_v13 = vrot.slane %v1343_v7, %v3313_v5  ;;  %v1295_v41 = vsel %vm1291_vm7, %v4185_v49, %v4255_v30  ;;  %v1348_v51 = vmul.f32 %v3840_v24, %v1299_v0  ;;  %v390_v61 = vsel %vm388_vm0, %v381_v11, %v3531_v40 }
 0x10e   : > { %v4268_v62 = vmax.f32 %v1393_v46, 0.0  ;;  %v1344_v6 = vmul.f32 %v5196_v19, %v1295_v41  ;;  %v1386_v39 = vmul.f32 %v1360_v10, %v4197_v60  ;;  %v391_v55 = vsel %vm388_vm0, %v5163_v25, %v381_v11  ;;  %v5200_v41 = vld [vmem:[#allocation68_spill] sm:$0xff] }
 0x10f   : > { %v4271_v43 = vpop.permute.xlu0 %1159  ;;  %v1387_v47 = vmul.f32 %v1364_v13, %v4197_v60  ;;  %v1093_v50 = vmul.f32 %v5197_v48, %v1042_v3  ;;  %v1266_v33 = vmul.f32 %v1258_v35, %v4081_v23  ;;  %v1384_v11 = vrot.slane %v1348_v51, %v3313_v5  ;;  %v5199_v13 = vld [vmem:[#allocation67_spill] sm:$0xff] }
 0x110   : > { %v1168_v49 = vsel %vm1165_vm6, %v4095_v58, %v4271_v43  ;;  %v1368_v1 = vrot.slane %v1344_v6, %v3313_v5  ;;  %1409 = vrot.lane.b32.xlu1 %v4268_v62, %s3237_s9  ;;  %v4290_v40 = vpop.permute.xlu1 %907  ;;  %v1394_v0 = vadd.f32 %v1386_v39, %v1268_v17  ;;  %v1270_v58 = vadd.f32 %v1262_v44, %v1144_v9  ;;  %v5220_v48 = vld [vmem:[#allocation83_spill] sm:$0xff] }
 0x111   : > { %v1219_v38 = vmul.f32 %v5198_v29, %v1168_v49  ;;  %v1395_v27 = vadd.f32 %v1387_v47, %v1269_v54  ;;  %v916_v25 = vsel %vm913_vm4, %v3771_v59, %v4290_v40  ;;  %v443_v3 = vmul.f32 %v5199_v13, %v391_v55 }
 0x112   : > { %v1388_v7 = vmul.f32 %v1368_v1, %v4197_v60  ;;  %v967_v46 = vmul.f32 %v3889_v37, %v916_v25  ;;  %v444_v35 = vmul.f32 %v5200_v41, %v390_v61  ;;  %v4304_v17 = vmax.f32 %v1394_v0, 0.0  ;;  %v5202_v25 = vld [vmem:[#allocation73_spill] sm:$0xff] }
 0x113   : > { %v4300_v10 = vpop.permute.xlu0 %1285  ;;  %v4306_v54 = vmax.f32 %v1395_v27, 0.0  ;;  %v1120_v6 = vrot.slane %v1093_v50, %v3313_v5  ;;  %v1246_v9 = vrot.slane %v1219_v38, %v3313_v5  ;;  %v1148_v39 = vadd.f32 %v4231_v36, %v4193_v31  ;;  %v5201_v36 = vld [vmem:[#allocation72_spill] sm:$0xff] }
 0x114   : > { %v1396_v59 = vadd.f32 %v1388_v7, %v1270_v58  ;;  %v994_v44 = vrot.slane %v967_v46, %v3313_v5  ;;  %v510_v51 = vpop.permute.xlu1 %509  ;;  %1411 = vrot.lane.b32.xlu0 %v4304_v17, %s3237_s9  ;;  %v893_v55 = vadd.f32 %v4127_v53, %v873_v14  ;;  %v1392_v0 = vmul.f32 %v1384_v11, %v4197_v60  ;;  %v5203_v11 = vld [vmem:[#allocation15_spill] sm:$0xff] }
 0x115   : > { %1413 = vrot.lane.b32.xlu1 %v4306_v54, %s3237_s9  ;;  %v517_v61 = vsel %vm515_vm1, %v510_v51, %v3541_v45  ;;  %v518_v47 = vsel %vm515_vm1, %v3798_v57, %v510_v51  ;;  %v1274_v38 = vadd.f32 %v1266_v33, %v1148_v39  ;;  %v474_v27 = vrot.slane %v443_v3, %v3313_v5  ;;  %v5205_v39 = vld [vmem:[#allocation77_spill] sm:$0xff] }
 0x116   : > { %v4323_v49 = vmax.f32 %v1396_v59, 0.0  ;;  %v1011_v31 = vmul.f32 %v994_v44, %v5185_v4  ;;  %v570_v50 = vmul.f32 %v5201_v36, %v518_v47  ;;  %v571_v45 = vmul.f32 %v5202_v25, %v517_v61  ;;  %v5204_v44 = vld [vmem:[#allocation76_spill] sm:$0xff] }
 0x117   : > { %v1036_v1 = vpop.permute.xlu0 %1035  ;;  %v478_v58 = vrot.slane %v444_v35, %v3313_v5  ;;  %v1137_v57 = vmul.f32 %v1120_v6, %v3966_v52  ;;  %v1263_v7 = vmul.f32 %v1246_v9, %v4081_v23  ;;  %v1400_v9 = vadd.f32 %v1392_v0, %v1274_v38  ;;  %v5206_v47 = vld [vmem:[#allocation8_spill] sm:$0xff]  ;;  %v5210_v0 = vld [vmem:[#allocation75_spill] sm:$0xff] }
 0x118   : > { %v1019_v46 = vadd.f32 %v1011_v31, %v893_v55  ;;  %v636_v53 = vpop.permute.xlu1 %635  ;;  %v600_v14 = vrot.slane %v570_v50, %v3313_v5  ;;  %v1041_v33 = vsel %vm1039_vm5, %v4246_v42, %v1036_v1  ;;  %1415 = vrot.lane.b32.xlu0 %v4323_v49, %s3237_s9  ;;  %v604_v6 = vrot.slane %v571_v45, %v3313_v5  ;;  %v5207_v50 = vld [vmem:[#allocation74_spill] sm:$0xff] }
 0x119   : > { %1449 = vrot.lane.b32.xlu1 %v4268_v62, %s3239_s10  ;;  %v643_v3 = vsel %vm641_vm2, %v636_v53, %v5203_v11  ;;  %v1040_v59 = vsel %vm1039_vm5, %v1036_v1, %v4026_v2  ;;  %v644_v42 = vsel %vm641_vm2, %v4006_v8, %v636_v53  ;;  %v4356_v55 = vrot.slane %v3752_v20, %v5206_v47  ;;  %v5208_v2 = vld [vmem:[#allocation12_spill] sm:$0xff]  ;;  %v5209_v11 = vld [vmem:[#allocation9_spill] sm:$0xff] }
 0x11a   : > { %v1145_v35 = vadd.f32 %v1137_v57, %v1019_v46  ;;  %v696_v51 = vmul.f32 %v5204_v44, %v644_v42  ;;  %v697_v61 = vmul.f32 %v5205_v39, %v643_v3  ;;  %v1094_v45 = vmul.f32 %v5207_v50, %v1041_v33  ;;  %v5214_v47 = vld [vmem:[#allocation80_spill] sm:$0xff] }
 0x11b   : > { %v1288_v57 = vpop.permute.xlu0 %1287  ;;  %v886_v1 = vmul.f32 %v5170_v15, %v5208_v2  ;;  %v887_v8 = vmul.f32 %v5170_v15, %v5209_v11  ;;  %v614_v38 = vmul.f32 %v600_v14, %v3499_v32  ;;  %v1095_v53 = vmul.f32 %v5210_v0, %v1040_v59  ;;  %v5212_v15 = vld [vmem:[#allocation36_spill] sm:$0xff] }
 0x11c   : > { %v4358_v31 = vadd.f32 %v1263_v7, %v1145_v35  ;;  %v762_v46 = vpop.permute.xlu1 %761  ;;  %v726_v3 = vrot.slane %v696_v51, %v3313_v5  ;;  %v730_v20 = vrot.slane %v697_v61, %v3313_v5  ;;  %v5211_v7 = vld [vmem:[#allocation13_spill] sm:$0xff]  ;;  %v615_v42 = vmul.f32 %v604_v6, %v3499_v32  ;;  %1451 = vrot.lane.b32.xlu0 %v4304_v17, %s3239_s10 }
 0x11d   : > { %1453 = vrot.lane.b32.xlu1 %v4306_v54, %s3239_s10  ;;  %v488_v33 = vmul.f32 %v474_v27, %v5211_v7  ;;  %v489_v35 = vmul.f32 %v478_v58, %v5211_v7  ;;  %v769_v14 = vsel %vm767_vm3, %v762_v46, %v5212_v15  ;;  %v4379_v59 = vmax.f32 %v1400_v9, 0.0  ;;  %v5213_v58 = vld [vmem:[#allocation21_spill] sm:$0xff] }
 0x11e   : > { %v1292_v51 = vsel %vm1291_vm7, %v1288_v57, %v4208_v21  ;;  %v1293_v27 = vsel %vm1291_vm7, %v4300_v10, %v1288_v57  ;;  %v770_v32 = vsel %vm767_vm3, %v5213_v58, %v762_v46  ;;  %v740_v6 = vmul.f32 %v726_v3, %v5162_v28  ;;  %v5215_v9 = vld [vmem:[#allocation81_spill] sm:$0xff]  ;;  %v5219_v58 = vld [vmem:[#allocation82_spill] sm:$0xff] }
 0x11f   : > { %v741_v61 = vmul.f32 %v730_v20, %v5162_v28  ;;  %v822_v2 = vmul.f32 %v5214_v47, %v770_v32  ;;  %v823_v11 = vmul.f32 %v5215_v9, %v769_v14  ;;  %v622_v15 = vadd.f32 %v614_v38, %v488_v33  ;;  %v5216_v57 = vld [vmem:[#allocation65_spill] sm:$0xff]  ;;  %v5217_v38 = vld [vmem:[#allocation78_spill] sm:$0xff]  ;;  %v5218_v33 = vld [vmem:[#allocation79_spill] sm:$0xff] }
 0x120   : > { %v910_v7 = vpop.permute.xlu1 %909  ;;  %v1124_v21 = vrot.slane %v1094_v45, %v3313_v5  ;;  %v1128_v24 = vrot.slane %v1095_v53, %v3313_v5  ;;  %v623_v3 = vadd.f32 %v615_v42, %v489_v35  ;;  %1455 = vrot.lane.b32.xlu0 %v4323_v49, %s3239_s10  ;;  %v1346_v53 = vmul.f32 %v5217_v38, %v1293_v27 }
 0x121   : > { %1423 = vrot.lane.b32.xlu1 %v4379_v59, %s3237_s9  ;;  %v914_v46 = vsel %vm913_vm4, %v910_v7, %v5216_v57  ;;  %v852_v28 = vrot.slane %v822_v2, %v3313_v5  ;;  %v856_v20 = vrot.slane %v823_v11, %v3313_v5  ;;  %v915_v45 = vsel %vm913_vm4, %v4290_v40, %v910_v7 }
 0x122   : > { %v1347_v14 = vmul.f32 %v5218_v33, %v1292_v51  ;;  %v968_v32 = vmul.f32 %v5219_v58, %v915_v45  ;;  %v969_v57 = vmul.f32 %v5220_v48, %v914_v46  ;;  %v748_v35 = vadd.f32 %v740_v6, %v622_v15 }
 0x123   : > { %v749_v42 = vadd.f32 %v741_v61, %v623_v3  ;;  %v866_v2 = vmul.f32 %v852_v28, %v5165_v34  ;;  %v867_v11 = vmul.f32 %v856_v20, %v5165_v34  ;;  %v5221_v34 = vld [vmem:[#allocation17_spill] sm:$0xff]  ;;  %v1376_v45 = vrot.slane %v1346_v53, %v3313_v5 }
 0x124   : > { %v1162_v0 = vpop.permute.xlu1 %1161  ;;  %v998_v50 = vrot.slane %v968_v32, %v3313_v5  ;;  %v1002_v63 = vrot.slane %v969_v57, %v3313_v5  ;;  %1463 = vrot.lane.b32.xlu0 %v4379_v59, %s3239_s10  ;;  %v1380_v32 = vrot.slane %v1347_v14, %v3313_v5 }
 0x125   : > { %1489 = vrot.lane.b32.xlu1 %v4268_v62, %s3240_s11  ;;  %v1166_v40 = vsel %vm1165_vm6, %v1162_v0, %v4123_v18  ;;  %v1167_v51 = vsel %vm1165_vm6, %v4271_v43, %v1162_v0  ;;  %v874_v27 = vadd.f32 %v866_v2, %v748_v35  ;;  %v875_v6 = vadd.f32 %v867_v11, %v749_v42 }
 0x126   : > { %v1220_v61 = vmul.f32 %v5221_v34, %v1167_v51  ;;  %v1221_v7 = vmul.f32 %v4356_v55, %v1166_v40  ;;  %v1012_v15 = vmul.f32 %v998_v50, %v5185_v4  ;;  %v1013_v46 = vmul.f32 %v1002_v63, %v5185_v4 }
 0x127   : > { %v894_v3 = vadd.f32 %v886_v1, %v874_v27  ;;  %v895_v28 = vadd.f32 %v887_v8, %v875_v6  ;;  %v1138_v43 = vmul.f32 %v1124_v21, %v3966_v52  ;;  %v1139_v0 = vmul.f32 %v1128_v24, %v3966_v52  ;;  %v5222_v21 = vld [vmem:[#allocation10_spill] sm:$0xff]  ;;  %v5223_v24 = vld [vmem:[#allocation56_spill] sm:$0xff] }
 0x128   : > { %v1250_v18 = vrot.slane %v1220_v61, %v3313_v5  ;;  %v1254_v20 = vrot.slane %v1221_v7, %v3313_v5  ;;  %1491 = vrot.lane.b32.xlu0 %v4304_v17, %s3240_s11  ;;  %v4444_v52 = vrot.slane %v5223_v24, %v5222_v21  ;;  %v1390_v53 = vmul.f32 %v1376_v45, %v4197_v60  ;;  %v5226_v21 = vld [vmem:[#allocation26_spill] sm:$0xff] }
 0x129   : > { %1493 = vrot.lane.b32.xlu1 %v4306_v54, %s3240_s11  ;;  %v1020_v50 = vadd.f32 %v1012_v15, %v894_v3  ;;  %v1021_v57 = vadd.f32 %v1013_v46, %v895_v28  ;;  %v1391_v14 = vmul.f32 %v1380_v32, %v4197_v60  ;;  %v3251_v27 = vmov 0.0   ;;  %v5225_v32 = vld [vmem:[#allocation25_spill] sm:$0xff] }
 0x12a   : > { %v1264_v4 = vmul.f32 %v1250_v18, %v4081_v23  ;;  %v1265_v63 = vmul.f32 %v1254_v20, %v4081_v23  ;;  %v1294_v23 = vsel %vm1291_vm7, %v4255_v30, %v4300_v10  ;;  %1959 = vmatprep.mubr.f32.mxu1 %v3251_v27  ;;  %1882 = vmatprep.mubr.f32.mxu0 %v3251_v27 }
 0x12b   : > { %v1146_v1 = vadd.f32 %v1138_v43, %v1020_v50  ;;  %v1147_v8 = vadd.f32 %v1139_v0, %v1021_v57  ;;  %v1345_v40 = vmul.f32 %v4444_v52, %v1294_v23  ;;  %v5224_v0 = vld [vmem:[#allocation20_spill] sm:$0xff] }
 0x12c   : > { %1495 = vrot.lane.b32.xlu0 %v4323_v49, %s3240_s11 }
 0x12d   : > { %1529 = vrot.lane.b32.xlu1 %v4268_v62, %s3242_s12  ;;  %v1272_v35 = vadd.f32 %v1264_v4, %v1146_v1  ;;  %v1273_v42 = vadd.f32 %v1265_v63, %v1147_v8  ;;  %v1372_v51 = vrot.slane %v1345_v40, %v3313_v5 }
 0x12f   : > { %v1398_v2 = vadd.f32 %v1390_v53, %v1272_v35  ;;  %v1399_v11 = vadd.f32 %v1391_v14, %v1273_v42  ;;  %v1389_v30 = vmul.f32 %v1372_v51, %v4197_v60  ;;  %v5227_v14 = vld [vmem:[#allocation24_spill] sm:$0xff]  ;;  %v5228_v42 = vld [vmem:[#allocation27_spill] sm:$0xff] }
 0x130   : > { %1531 = vrot.lane.b32.xlu0 %v4304_v17, %s3242_s12 }
 0x131   : > { %1533 = vrot.lane.b32.xlu1 %v4306_v54, %s3242_s12  ;;  %v1397_v10 = vadd.f32 %v1389_v30, %v4358_v31  ;;  %v4502_v60 = vmax.f32 %v1398_v2, 0.0  ;;  %v4508_v31 = vmax.f32 %v1399_v11, 0.0  ;;  %v5229_v2 = vld [vmem:[#allocation22_spill] sm:$0xff] }
 0x133   : > { %v4476_v5 = vmax.f32 %v1397_v10, 0.0 }
 0x134   : > { %1535 = vrot.lane.b32.xlu0 %v4323_v49, %s3242_s12 }
 0x135   : > { %1503 = vrot.lane.b32.xlu1 %v4379_v59, %s3240_s11 }
 0x138   : > { %1543 = vrot.lane.b32.xlu0 %v4379_v59, %s3242_s12 }
 0x139   : > { %1579 = vrot.lane.b32.xlu1 %v4304_v17, %s3245_s13 }
 0x13c   : > { %1581 = vrot.lane.b32.xlu0 %v4306_v54, %s3245_s13 }
 0x13d   : > { %1583 = vrot.lane.b32.xlu1 %v4323_v49, %s3245_s13 }
 0x140   : > { %1585 = vrot.lane.b32.xlu0 %v4476_v5, %s3245_s13 }
 0x141   : > { %1577 = vrot.lane.b32.xlu1 %v4268_v62, %s3245_s13 }
 0x144   : > { %1619 = vrot.lane.b32.xlu0 %v4304_v17, %s3247_s14 }
 0x145   : > { %1621 = vrot.lane.b32.xlu1 %v4306_v54, %s3247_s14 }
 0x148   : > { %1623 = vrot.lane.b32.xlu0 %v4323_v49, %s3247_s14 }
 0x149   : > { %1625 = vrot.lane.b32.xlu1 %v4476_v5, %s3247_s14 }
 0x14c   : > { %1659 = vrot.lane.b32.xlu0 %v4304_v17, %s3249_s15 }
 0x14d   : > { %1661 = vrot.lane.b32.xlu1 %v4306_v54, %s3249_s15 }
 0x150   : > { %1663 = vrot.lane.b32.xlu0 %v4323_v49, %s3249_s15 }
 0x151   : > { %1665 = vrot.lane.b32.xlu1 %v4476_v5, %s3249_s15 }
 0x154   : > { %1617 = vrot.lane.b32.xlu0 %v4268_v62, %s3247_s14 }
 0x155   : > { %1657 = vrot.lane.b32.xlu1 %v4268_v62, %s3249_s15 }
 0x158   : > { %1417 = vrot.lane.b32.xlu0 %v4476_v5, %s3237_s9 }
 0x159   : > { %1419 = vrot.lane.b32.xlu1 %v4502_v60, %s3237_s9 }
 0x15c   : > { %1421 = vrot.lane.b32.xlu0 %v4508_v31, %s3237_s9 }
 0x15d   : > { %1457 = vrot.lane.b32.xlu1 %v4476_v5, %s3239_s10 }
 0x160   : > { %1459 = vrot.lane.b32.xlu0 %v4502_v60, %s3239_s10 }
 0x161   : > { %1461 = vrot.lane.b32.xlu1 %v4508_v31, %s3239_s10 }
 0x164   : > { %1699 = vrot.lane.b32.xlu0 %v4304_v17, %s3250_s16 }
 0x165   : > { %1701 = vrot.lane.b32.xlu1 %v4306_v54, %s3250_s16 }
 0x168   : > { %1703 = vrot.lane.b32.xlu0 %v4323_v49, %s3250_s16 }
 0x169   : > { %1705 = vrot.lane.b32.xlu1 %v4476_v5, %s3250_s16 }
 0x16c   : > { %1697 = vrot.lane.b32.xlu0 %v4268_v62, %s3250_s16 }
 0x16d   : > { %1497 = vrot.lane.b32.xlu1 %v4476_v5, %s3240_s11 }
 0x170   : > { %1499 = vrot.lane.b32.xlu0 %v4502_v60, %s3240_s11 }
 0x171   : > { %1501 = vrot.lane.b32.xlu1 %v4508_v31, %s3240_s11  ;;  %s4952_s11 = scalar_lea.vmem %s4987_s6, %s3060_s22 }
 0x174   : > { %1537 = vrot.lane.b32.xlu0 %v4476_v5, %s3242_s12 }
 0x175   : > { %1539 = vrot.lane.b32.xlu1 %v4502_v60, %s3242_s12 }
 0x178   : > { %1541 = vrot.lane.b32.xlu0 %v4508_v31, %s3242_s12 }
 0x179   : > { %1587 = vrot.lane.b32.xlu1 %v4502_v60, %s3245_s13 }
 0x17c   : > { %1589 = vrot.lane.b32.xlu0 %v4508_v31, %s3245_s13 }
 0x17d   : > { %1591 = vrot.lane.b32.xlu1 %v4379_v59, %s3245_s13 }
 0x180   : > { %1627 = vrot.lane.b32.xlu0 %v4502_v60, %s3247_s14 }
 0x181   : > { %1629 = vrot.lane.b32.xlu1 %v4508_v31, %s3247_s14 }
 0x182   : > { %v1410_v6 = vpop.permute.xlu1 %1409 }
 0x184   : > { %1631 = vrot.lane.b32.xlu0 %v4379_v59, %s3247_s14 }
 0x185   : > { %1667 = vrot.lane.b32.xlu1 %v4502_v60, %s3249_s15 }
 0x186   : > { %v1412_v61 = vpop.permute.xlu0 %1411 }
 0x187   : > { %v1414_v7 = vpop.permute.xlu1 %1413  ;;  %v1431_v3 = vsel %vm388_vm0, %v1410_v6, %v1412_v61 }
 0x188   : > { %1669 = vrot.lane.b32.xlu0 %v4508_v31, %s3249_s15  ;;  %v1434_v45 = vmul.f32 %v1431_v3, %v5224_v0  ;;  %v1430_v63 = vsel %vm388_vm0, %v1412_v61, %v1414_v7  ;;  %v5230_v3 = vld [vmem:[#allocation23_spill] sm:$0xff] }
 0x189   : > { %1671 = vrot.lane.b32.xlu1 %v4379_v59, %s3249_s15  ;;  %v1435_v11 = vmul.f32 %v1430_v63, %v5229_v2 }
 0x18a   : > { %v4560_v15 = vpop.permute.xlu0 %1415 }
 0x18b   : > { %v1450_v46 = vpop.permute.xlu1 %1449  ;;  %v1429_v57 = vsel %vm388_vm0, %v1414_v7, %v4560_v15 }
 0x18c   : > { %1707 = vrot.lane.b32.xlu0 %v4502_v60, %s3250_s16  ;;  %v1436_v35 = vmul.f32 %v1429_v57, %v5227_v14 }
 0x18d   : > { %1709 = vrot.lane.b32.xlu1 %v4508_v31, %s3250_s16 }
 0x18e   : > { %v1452_v18 = vpop.permute.xlu0 %1451 }
 0x18f   : > { %v1454_v28 = vpop.permute.xlu1 %1453  ;;  %v1471_v20 = vsel %vm515_vm1, %v1450_v46, %v1452_v18 }
 0x190   : > { %v1470_v43 = vsel %vm515_vm1, %v1452_v18, %v1454_v28  ;;  %1711 = vrot.lane.b32.xlu0 %v4379_v59, %s3250_s16  ;;  %v1474_v50 = vmul.f32 %v1471_v20, %v5225_v32  ;;  %v5231_v18 = vld [vmem:[#allocation29_spill] sm:$0xff] }
 0x191   : > { %v1475_v24 = vmul.f32 %v1470_v43, %v5226_v21 }
 0x192   : > { %v4583_v1 = vpop.permute.xlu0 %1455  ;;  %v3061_v8 = vpack.c.bf16 %v1474_v50, %v1434_v45 }
 0x193   : > { %v4579_v4 = vpop.permute.xlu1 %1423  ;;  %v1469_v53 = vsel %vm515_vm1, %v1454_v28, %v4583_v1  ;;  %v3079_v7 = vpack.c.bf16 %v1475_v24, %v1435_v11  ;;  %v5233_v24 = vld [vmem:[#allocation38_spill] sm:$0xff] }
 0x194   : > { %3062 = vmatprep.subr.bf16.mxu0 %v3061_v8  ;;  %v1476_v23 = vmul.f32 %v1469_v53, %v5228_v42  ;;  %v1432_v40 = vsel %vm388_vm0, %v4579_v4, %v1410_v6  ;;  %v5232_v8 = vld [vmem:[#allocation33_spill] sm:$0xff] }
 0x195   : > { %v1433_v28 = vmul.f32 %v1432_v40, %v5230_v3  ;;  %v5234_v40 = vld [vmem:[#allocation39_spill] sm:$0xff] }
 0x196   : > { %v4595_v30 = vpop.permute.xlu0 %1463  ;;  %v3077_v10 = vpack.c.bf16 %v1476_v23, %v1436_v35 }
 0x197   : > { %v1490_v51 = vpop.permute.xlu1 %1489  ;;  %v1472_v61 = vsel %vm515_vm1, %v4595_v30, %v1450_v46 }
 0x198   : > { %v1473_v20 = vmul.f32 %v1472_v61, %v5231_v18  ;;  %3078 = vmatprep.subr.bf16.mxu1 %v3077_v10 }
 0x199   : > { %3080 = vmatpush1.bf16.msra.mxu1 %v3079_v7  ;;  %v5235_v7 = vld [vmem:[#allocation37_spill] sm:$0xff] }
 0x19a   : > { %v1492_v0 = vpop.permute.xlu0 %1491  ;;  %v3063_v45 = vpack.c.bf16 %v1473_v20, %v1433_v28  ;;  %v5236_v28 = vld [vmem:[#allocation40_spill] sm:$0xff]  ;;  %v5237_v20 = vld [vmem:[#allocation34_spill] sm:$0xff] }
 0x19b   : > { %v1494_v43 = vpop.permute.xlu1 %1493  ;;  %v1511_v50 = vsel %vm641_vm2, %v1490_v51, %v1492_v0 }
 0x19c   : > { %3064 = vmatpush1.bf16.msra.mxu0 %v3063_v45  ;;  %v1514_v21 = vmul.f32 %v1511_v50, %v5232_v8  ;;  %v1510_v23 = vsel %vm641_vm2, %v1492_v0, %v1494_v43  ;;  %v5238_v8 = vld [vmem:[#allocation32_spill] sm:$0xff] }
 0x19d   : > { %v1515_v45 = vmul.f32 %v1510_v23, %v5237_v20 }
 0x19e   : > { %v4602_v32 = vpop.permute.xlu0 %1495 }
 0x19f   : > { %v1530_v6 = vpop.permute.xlu1 %1529  ;;  %v1509_v35 = vsel %vm641_vm2, %v1494_v43, %v4602_v32 }
 0x1a0   : > { %v1516_v3 = vmul.f32 %v1509_v35, %v5235_v7 }
 0x1a2   : > { %v1532_v63 = vpop.permute.xlu0 %1531 }
 0x1a3   : > { %v1534_v57 = vpop.permute.xlu1 %1533  ;;  %v1551_v46 = vsel %vm767_vm3, %v1530_v6, %v1532_v63 }
 0x1a4   : > { %v1554_v53 = vmul.f32 %v1551_v46, %v5233_v24  ;;  %v1550_v14 = vsel %vm767_vm3, %v1532_v63, %v1534_v57  ;;  %v5239_v24 = vld [vmem:[#allocation42_spill] sm:$0xff] }
 0x1a5   : > { %v1555_v10 = vmul.f32 %v1550_v14, %v5234_v40 }
 0x1a6   : > { %v4619_v2 = vpop.permute.xlu0 %1535  ;;  %v3065_v11 = vpack.c.bf16 %v1554_v53, %v1514_v21 }
 0x1a7   : > { %v4615_v42 = vpop.permute.xlu1 %1503  ;;  %v1549_v61 = vsel %vm767_vm3, %v1534_v57, %v4619_v2  ;;  %v3083_v57 = vpack.c.bf16 %v1555_v10, %v1515_v45  ;;  %v5242_v45 = vld [vmem:[#allocation47_spill] sm:$0xff] }
 0x1a8   : > { %v1556_v18 = vmul.f32 %v1549_v61, %v5236_v28  ;;  %3066 = vmatprep.subr.bf16.mxu0 %v3065_v11  ;;  %v1512_v43 = vsel %vm641_vm2, %v4615_v42, %v1490_v51  ;;  %v5240_v11 = vld [vmem:[#allocation49_spill] sm:$0xff]  ;;  %v5241_v28 = vld [vmem:[#allocation50_spill] sm:$0xff] }
 0x1a9   : > { %v1513_v21 = vmul.f32 %v1512_v43, %v5238_v8 }
 0x1aa   : > { %v4631_v50 = vpop.permute.xlu0 %1543  ;;  %v3081_v63 = vpack.c.bf16 %v1556_v18, %v1516_v3 }
 0x1ab   : > { %v1580_v0 = vpop.permute.xlu1 %1579  ;;  %v1552_v46 = vsel %vm767_vm3, %v4631_v50, %v1530_v6 }
 0x1ac   : > { %v1553_v53 = vmul.f32 %v1552_v46, %v5239_v24  ;;  %3082 = vmatprep.subr.bf16.mxu1 %v3081_v63  ;;  %v5243_v63 = vld [vmem:[#allocation51_spill] sm:$0xff] }
 0x1ad   : > { %3084 = vmatpush1.bf16.msra.mxu1 %v3083_v57 }
 0x1ae   : > { %v1582_v35 = vpop.permute.xlu0 %1581  ;;  %v3067_v23 = vpack.c.bf16 %v1553_v53, %v1513_v21 }
 0x1af   : > { %v1584_v14 = vpop.permute.xlu1 %1583  ;;  %v1598_v51 = vsel %vm913_vm4, %v1580_v0, %v1582_v35 }
 0x1b0   : > { %v1602_v40 = vmul.f32 %v1598_v51, %v5240_v11  ;;  %v1597_v61 = vsel %vm913_vm4, %v1582_v35, %v1584_v14  ;;  %3068 = vmatpush1.bf16.msra.mxu0 %v3067_v23 }
 0x1b1   : > { %v1603_v18 = vmul.f32 %v1597_v61, %v5241_v28 }
 0x1b2   : > { %v4645_v10 = vpop.permute.xlu0 %1585  ;;  %v3069_v3 = vpack.c.bf16 %v1602_v40, %v4304_v17 }
 0x1b3   : > { %v4643_v6 = vpop.permute.xlu1 %1577  ;;  %v1596_v20 = vsel %vm913_vm4, %v1584_v14, %v4645_v10  ;;  %v3087_v17 = vpack.c.bf16 %v1603_v18, %v4306_v54 }
 0x1b4   : > { %v1599_v7 = vsel %vm913_vm4, %v4643_v6, %v1580_v0  ;;  %v1604_v46 = vmul.f32 %v1596_v20, %v5243_v63  ;;  %3070 = vmatprep.subr.bf16.mxu0 %v3069_v3  ;;  %v5245_v20 = vld [vmem:[#allocation57_spill] sm:$0xff]  ;;  %v5247_v63 = vld [vmem:[#allocation63_spill] sm:$0xff] }
 0x1b5   : > { %v1601_v43 = vmul.f32 %v1599_v7, %v5242_v45  ;;  %v5246_v45 = vld [vmem:[#allocation58_spill] sm:$0xff] }
 0x1b6   : > { %v1620_v21 = vpop.permute.xlu0 %1619  ;;  %v3085_v24 = vpack.c.bf16 %v1604_v46, %v4323_v49 }
 0x1b7   : > { %v1622_v57 = vpop.permute.xlu1 %1621  ;;  %v3071_v8 = vpack.c.bf16 %v1601_v43, %v4268_v62  ;;  %v5244_v62 = vld [vmem:[#allocation55_spill] sm:$0xff] }
 0x1b8   : > { %3086 = vmatprep.subr.bf16.mxu1 %v3085_v24  ;;  %v1638_v14 = vsel %vm1039_vm5, %v1620_v21, %v1622_v57 }
 0x1b9   : > { %3072 = vmatpush1.bf16.msra.mxu0 %v3071_v8  ;;  %3088 = vmatpush1.bf16.msra.mxu1 %v3087_v17  ;;  %v1642_v11 = vmul.f32 %v1638_v14, %v5244_v62  ;;  %v5249_v62 = vld [vmem:[#allocation61_spill] sm:$0xff] }
 0x1ba   : > { %v1624_v53 = vpop.permute.xlu0 %1623 }
 0x1bb   : > { %v4660_v0 = vpop.permute.xlu1 %1625  ;;  %v1637_v54 = vsel %vm1039_vm5, %v1622_v57, %v1624_v53  ;;  %v5248_v57 = vld [vmem:[#allocation64_spill] sm:$0xff] }
 0x1bc   : > { %v1636_v40 = vsel %vm1039_vm5, %v1624_v53, %v4660_v0 }
 0x1bd   : > { %v1644_v43 = vmul.f32 %v1636_v40, %v5246_v45  ;;  %v5251_v45 = vld [vmem:[#allocation30_spill] sm:$0xff] }
 0x1be   : > { %v1660_v23 = vpop.permute.xlu0 %1659 }
 0x1bf   : > { %v1662_v35 = vpop.permute.xlu1 %1661 }
 0x1c0   : > { %v1678_v51 = vsel %vm1165_vm6, %v1660_v23, %v1662_v35 }
 0x1c1   : > { %v1682_v49 = vmul.f32 %v1678_v51, %v5192_v12  ;;  %v1643_v12 = vmul.f32 %v1637_v54, %v5245_v20 }
 0x1c2   : > { %v1664_v7 = vpop.permute.xlu0 %1663 }
 0x1c3   : > { %v4673_v61 = vpop.permute.xlu1 %1665  ;;  %v3073_v3 = vpack.c.bf16 %v1682_v49, %v1642_v11  ;;  %v1677_v28 = vsel %vm1165_vm6, %v1662_v35, %v1664_v7  ;;  %v5250_v49 = vld [vmem:[#allocation54_spill] sm:$0xff] }
 0x1c4   : > { %v1676_v18 = vsel %vm1165_vm6, %v1664_v7, %v4673_v61  ;;  %v1683_v46 = vmul.f32 %v1677_v28, %v5247_v63  ;;  %v5252_v63 = vld [vmem:[#allocation31_spill] sm:$0xff] }
 0x1c5   : > { %v1684_v8 = vmul.f32 %v1676_v18, %v5248_v57  ;;  %3074 = vmatprep.subr.bf16.mxu0 %v3073_v3 }
 0x1c6   : > { %v4686_v17 = vpop.permute.xlu0 %1617  ;;  %v3091_v35 = vpack.c.bf16 %v1683_v46, %v1643_v12 }
 0x1c7   : > { %v4684_v24 = vpop.permute.xlu1 %1657  ;;  %v3089_v14 = vpack.c.bf16 %v1684_v8, %v1644_v43  ;;  %v1639_v51 = vsel %vm1039_vm5, %v4686_v17, %v1620_v21 }
 0x1c8   : > { %v1679_v53 = vsel %vm1165_vm6, %v4684_v24, %v1660_v23  ;;  %v1641_v54 = vmul.f32 %v1639_v51, %v5250_v49 }
 0x1c9   : > { %v1681_v11 = vmul.f32 %v1679_v53, %v5249_v62  ;;  %3090 = vmatprep.subr.bf16.mxu1 %v3089_v14 }
 0x1ca   : > { %3092 = vmatpush1.bf16.msra.mxu1 %v3091_v35  ;;  %v1418_v7 = vpop.permute.xlu0 %1417 }
 0x1cb   : > { %v1420_v40 = vpop.permute.xlu1 %1419  ;;  %v3075_v3 = vpack.c.bf16 %v1681_v11, %v1641_v54 }
 0x1cd   : > { %3076 = vmatpush1.bf16.msra.mxu0 %v3075_v3 }
 0x1ce   : > { %v1422_v18 = vpop.permute.xlu0 %1421 }
 0x1cf   : > { %v1458_v28 = vpop.permute.xlu1 %1457  ;;  %v1425_v23 = vsel %vm388_vm0, %v1422_v18, %v4579_v4 }
 0x1d0   : > { %v1440_v43 = vmul.f32 %v1425_v23, %v5251_v45  ;;  %v1468_v49 = vsel %vm515_vm1, %v4583_v1, %v1458_v28  ;;  %v1428_v1 = vsel %vm388_vm0, %v4560_v15, %v1418_v7 }
 0x1d2   : > { %v1460_v12 = vpop.permute.xlu0 %1459 }
 0x1d3   : > { %v1462_v20 = vpop.permute.xlu1 %1461  ;;  %v1467_v62 = vsel %vm515_vm1, %v1458_v28, %v1460_v12 }
 0x1d4   : > { %v1465_v21 = vsel %vm515_vm1, %v1462_v20, %v4595_v30  ;;  %v1466_v35 = vsel %vm515_vm1, %v1460_v12, %v1462_v20  ;;  %v1426_v30 = vsel %vm388_vm0, %v1420_v40, %v1422_v18  ;;  %v1427_v18 = vsel %vm388_vm0, %v1418_v7, %v1420_v40  ;;  %v5253_v40 = vld [vmem:[#allocation45_spill] sm:$0xff] }
 0x1d5   : > { %v1480_v46 = vmul.f32 %v1465_v21, %v5252_v63  ;;  %v1479_v54 = vmul.f32 %v1466_v35, %v5202_v25  ;;  %v1439_v25 = vmul.f32 %v1426_v30, %v5200_v41  ;;  %v1478_v28 = vmul.f32 %v1467_v62, %v5201_v36  ;;  %v4736_v21 = vld [vmem:[%s4984_s3] sm:$0xff]  ;;  %v5254_v36 = vld [vmem:[#allocation41_spill] sm:$0xff] }
 0x1d6   : > { %v1700_v53 = vpop.permute.xlu0 %1699  ;;  %v1477_v45 = vmul.f32 %v1468_v49, %v5253_v40  ;;  %v1437_v15 = vmul.f32 %v1428_v1, %v5254_v36  ;;  %v5258_v40 = vld [vmem:[#allocation43_spill] sm:$0xff] }
 0x1d7   : > { %v1702_v57 = vpop.permute.xlu1 %1701  ;;  %v3109_v8 = vpack.c.bf16 %v1480_v46, %v1440_v43  ;;  %v3111_v43 = vpack.c.bf16 %v1479_v54, %v1439_v25  ;;  %v5256_v54 = vld [vmem:[#allocation59_spill] sm:$0xff] }
 0x1d8   : > { %v1718_v14 = vsel %vm1291_vm7, %v1700_v53, %v1702_v57  ;;  %v5257_v25 = vld [vmem:[#allocation35_spill] sm:$0xff] }
 0x1d9   : > { %v1722_v4 = vmul.f32 %v1718_v14, %v3860_v16 }
 0x1da   : > { %v1704_v11 = vpop.permute.xlu0 %1703 }
 0x1db   : > { %v4709_v51 = vpop.permute.xlu1 %1705  ;;  %1834 = vmatprep.subr.mxu0 %v1722_v4  ;;  %v1717_v3 = vsel %vm1291_vm7, %v1702_v57, %v1704_v11  ;;  %v5255_v4 = vld [vmem:[#allocation52_spill] sm:$0xff] }
 0x1dc   : > { %v1716_v16 = vsel %vm1291_vm7, %v1704_v11, %v4709_v51  ;;  %v1723_v23 = vmul.f32 %v1717_v3, %v3864_v26 }
 0x1dd   : > { %v1724_v20 = vmul.f32 %v1716_v16, %v5196_v19  ;;  %v1438_v19 = vmul.f32 %v1427_v18, %v5199_v13  ;;  %v3095_v13 = vpack.c.bf16 %v1477_v45, %v1437_v15 }
 0x1de   : > { %v4739_v26 = vpop.permute.xlu0 %1697 }
 0x1df   : > { %v1498_v12 = vpop.permute.xlu1 %1497  ;;  %1911 = vmatprep.subr.mxu1 %v1724_v20  ;;  %v1719_v41 = vsel %vm1291_vm7, %v4739_v26, %v1700_v53  ;;  %v3093_v46 = vpack.c.bf16 %v1478_v28, %v1438_v19  ;;  %v4753_v53 = vld [vmem:[%s4984_s3 + $0x8] sm:$0xff] }
 0x1e0   : > { %1912 = vmatpush1.msra.mxu1 %v1723_v23  ;;  %v1721_v7 = vmul.f32 %v1719_v41, %v3835_v22  ;;  %v1508_v22 = vsel %vm641_vm2, %v4602_v32, %v1498_v12 }
 0x1e1   : > { %3110 = vmatprep.subr.bf16.mxu1 %v3109_v8  ;;  %3028 = vmatmul.mubr.msk.f32.vlgmr.msra.gmra.mrb[0].mxu1 %vm1811_vm8, %v4736_v21  ;;  %v1517_v30 = vmul.f32 %v1508_v22, %v5255_v4 }
 0x1e2   : > { %3112 = vmatpush1.bf16.msra.mxu1 %v3111_v43  ;;  %1965 = vmatprep.mubr.f32.mxu1 %v3251_v27  ;;  %v1500_v57 = vpop.permute.xlu0 %1499 }
 0x1e3   : > { %v1502_v63 = vpop.permute.xlu1 %1501  ;;  %1835 = vmatpush1.msra.mxu0 %v1721_v7  ;;  %v1507_v8 = vsel %vm641_vm2, %v1498_v12, %v1500_v57 }
 0x1e4   : > { %3094 = vmatprep.subr.bf16.mxu0 %v3093_v46  ;;  %3026 = vmatmul.mubr.msk.f32.vlgmr.msra.gmra.mrb[0].mxu0 %vm1811_vm8, %v4736_v21  ;;  %v1518_v11 = vmul.f32 %v1507_v8, %v5204_v44  ;;  %v1505_v49 = vsel %vm641_vm2, %v1502_v63, %v4615_v42 }
 0x1e5   : > { %3096 = vmatpush1.bf16.msra.mxu0 %v3095_v13  ;;  %1888 = vmatprep.mubr.f32.mxu0 %v3251_v27  ;;  %v1520_v28 = vmul.f32 %v1505_v49, %v5257_v25 }
 0x1e6   : > { %3029 = vmatmul.mubr.msk.f32.gmra.mrb[2].mxu1 %vm1811_vm8, %v4753_v53  ;;  %v1538_v35 = vpop.permute.xlu0 %1537 }
 0x1e7   : > { %v1540_v14 = vpop.permute.xlu1 %1539  ;;  %2113 = vmatprep.mubr.f32.mxu1 %v3251_v27  ;;  %v1548_v62 = vsel %vm767_vm3, %v4619_v2, %v1538_v35  ;;  %v1506_v2 = vsel %vm641_vm2, %v1500_v57, %v1502_v63  ;;  %v5259_v63 = vld [vmem:[#allocation46_spill] sm:$0xff] }
 0x1e8   : > { %v1547_v32 = vsel %vm767_vm3, %v1538_v35, %v1540_v14  ;;  %3027 = vmatmul.mubr.msk.f32.gmra.mrb[2].mxu0 %vm1811_vm8, %v4753_v53  ;;  %v1557_v3 = vmul.f32 %v1548_v62, %v5256_v54  ;;  %v5261_v54 = vld [vmem:[#allocation60_spill] sm:$0xff] }
 0x1e9   : > { %v1558_v16 = vmul.f32 %v1547_v32, %v5214_v47  ;;  %2036 = vmatprep.mubr.f32.mxu0 %v3251_v27  ;;  %v1519_v47 = vmul.f32 %v1506_v2, %v5205_v39  ;;  %v5260_v32 = vld [vmem:[#allocation53_spill] sm:$0xff] }
 0x1ea   : > { %v3099_v23 = vpack.c.bf16 %v1557_v3, %v1517_v30  ;;  %v1542_v20 = vpop.permute.xlu0 %1541 }
 0x1eb   : > { %v1588_v18 = vpop.permute.xlu1 %1587  ;;  %v3097_v1 = vpack.c.bf16 %v1558_v16, %v1518_v11  ;;  %v1545_v44 = vsel %vm767_vm3, %v1542_v20, %v4631_v50  ;;  %v1546_v42 = vsel %vm767_vm3, %v1540_v14, %v1542_v20  ;;  %v5262_v16 = vld [vmem:[#allocation74_spill] sm:$0xff]  ;;  %v5264_v20 = vld [vmem:[#allocation69_spill] sm:$0xff] }
 0x1ec   : > { %v1559_v12 = vmul.f32 %v1546_v42, %v5215_v9  ;;  %v1560_v45 = vmul.f32 %v1545_v44, %v5258_v40  ;;  %v1595_v19 = vsel %vm913_vm4, %v4645_v10, %v1588_v18 }
 0x1ed   : > { %3098 = vmatprep.subr.bf16.mxu0 %v3097_v1  ;;  %v1605_v39 = vmul.f32 %v1595_v19, %v3889_v37 }
 0x1ee   : > { %3100 = vmatpush1.bf16.msra.mxu0 %v3099_v23  ;;  %v3115_v41 = vpack.c.bf16 %v1559_v12, %v1519_v47  ;;  %v1590_v36 = vpop.permute.xlu0 %1589  ;;  %v3113_v15 = vpack.c.bf16 %v1560_v45, %v1520_v28 }
 0x1ef   : > { %v1592_v43 = vpop.permute.xlu1 %1591  ;;  %v1594_v9 = vsel %vm913_vm4, %v1588_v18, %v1590_v36  ;;  %v3103_v14 = vpack.c.bf16 %v1605_v39, %v4476_v5 }
 0x1f0   : > { %v1600_v50 = vsel %vm913_vm4, %v1592_v43, %v4643_v6  ;;  %v1593_v7 = vsel %vm913_vm4, %v1590_v36, %v1592_v43  ;;  %v1606_v46 = vmul.f32 %v1594_v9, %v5219_v58  ;;  %3114 = vmatprep.subr.bf16.mxu1 %v3113_v15  ;;  %v5265_v36 = vld [vmem:[#allocation66_spill] sm:$0xff] }
 0x1f1   : > { %v1608_v10 = vmul.f32 %v1600_v50, %v5259_v63  ;;  %v1607_v13 = vmul.f32 %v1593_v7, %v5220_v48  ;;  %3116 = vmatpush1.bf16.msra.mxu1 %v3115_v41 }
 0x1f2   : > { %v1628_v37 = vpop.permute.xlu0 %1627  ;;  %v3101_v8 = vpack.c.bf16 %v1606_v46, %v4502_v60 }
 0x1f3   : > { %v1630_v57 = vpop.permute.xlu1 %1629  ;;  %v3117_v6 = vpack.c.bf16 %v1608_v10, %v4379_v59  ;;  %v3119_v22 = vpack.c.bf16 %v1607_v13, %v4508_v31  ;;  %v1635_v4 = vsel %vm1039_vm5, %v4660_v0, %v1628_v37  ;;  %v5263_v0 = vld [vmem:[#allocation75_spill] sm:$0xff] }
 0x1f4   : > { %3102 = vmatprep.subr.bf16.mxu0 %v3101_v8  ;;  %v1634_v31 = vsel %vm1039_vm5, %v1628_v37, %v1630_v57  ;;  %v2142_v8 = vld [vmem:[%s4985_s4] sm:$0xff] }
 0x1f5   : > { %3118 = vmatprep.subr.bf16.mxu1 %v3117_v6  ;;  %3104 = vmatpush1.bf16.msra.mxu0 %v3103_v14  ;;  %v1646_v2 = vmul.f32 %v1634_v31, %v5262_v16  ;;  %v2143_v14 = vld [vmem:[%s4985_s4 + $0x8] sm:$0xff] }
 0x1f6   : > { %3120 = vmatpush1.bf16.msra.mxu1 %v3119_v22  ;;  %v1632_v58 = vpop.permute.xlu0 %1631 }
 0x1f7   : > { %v1668_v35 = vpop.permute.xlu1 %1667  ;;  %v1640_v59 = vsel %vm1039_vm5, %v1632_v58, %v4686_v17  ;;  %v1633_v5 = vsel %vm1039_vm5, %v1630_v57, %v1632_v58  ;;  %v2145_v58 = vld [vmem:[%s4985_s4 + $0x18] sm:$0xff] }
 0x1f8   : > { %v1675_v48 = vsel %vm1165_vm6, %v4673_v61, %v1668_v35  ;;  %v1648_v17 = vmul.f32 %v1640_v59, %v5260_v32  ;;  %v1647_v18 = vmul.f32 %v1633_v5, %v5263_v0 }
 0x1f9   : > { %v1685_v30 = vmul.f32 %v1675_v48, %v5198_v29 }
 0x1fa   : > { %v1670_v62 = vpop.permute.xlu0 %1669 }
 0x1fb   : > { %v1672_v60 = vpop.permute.xlu1 %1671  ;;  %v1674_v11 = vsel %vm1165_vm6, %v1668_v35, %v1670_v62  ;;  %v2144_v35 = vld [vmem:[%s4985_s4 + $0x10] sm:$0xff] }
 0x1fc   : > { %v1680_v61 = vsel %vm1165_vm6, %v1672_v60, %v4684_v24  ;;  %v1673_v49 = vsel %vm1165_vm6, %v1670_v62, %v1672_v60  ;;  %v1686_v29 = vmul.f32 %v1674_v11, %v5221_v34  ;;  %v1645_v24 = vmul.f32 %v1635_v4, %v5264_v20 }
 0x1fd   : > { %v1688_v3 = vmul.f32 %v1680_v61, %v5261_v54  ;;  %v1687_v23 = vmul.f32 %v1673_v49, %v4356_v55 }
 0x1fe   : > { %v1708_v44 = vpop.permute.xlu0 %1707  ;;  %v3105_v42 = vpack.c.bf16 %v1686_v29, %v1646_v2  ;;  %v3107_v47 = vpack.c.bf16 %v1685_v30, %v1645_v24 }
 0x1ff   : > { %v1710_v1 = vpop.permute.xlu1 %1709  ;;  %v3121_v25 = vpack.c.bf16 %v1688_v3, %v1648_v17  ;;  %v3123_v28 = vpack.c.bf16 %v1687_v23, %v1647_v18  ;;  %v1715_v40 = vsel %vm1291_vm7, %v4709_v51, %v1708_v44 }
 0x200   : > { %v1714_v12 = vsel %vm1291_vm7, %v1708_v44, %v1710_v1  ;;  %3106 = vmatprep.subr.bf16.mxu0 %v3105_v42  ;;  %v1725_v45 = vmul.f32 %v1715_v40, %v4444_v52 }
 0x201   : > { %3122 = vmatprep.subr.bf16.mxu1 %v3121_v25  ;;  %v1726_v34 = vmul.f32 %v1714_v12, %v5217_v38  ;;  %3108 = vmatpush1.bf16.msra.mxu0 %v3107_v47 }
 0x202   : > { %3124 = vmatpush1.bf16.msra.mxu1 %v3123_v28  ;;  %v1712_v55 = vpop.permute.xlu0 %1711 }
 0x203   : > { %1988 = vmatprep.subr.mxu0 %v1726_v34  ;;  %v1713_v19 = vsel %vm1291_vm7, %v1710_v1, %v1712_v55  ;;  %v1720_v43 = vsel %vm1291_vm7, %v1712_v55, %v4739_v26 }
 0x204   : > { %v1727_v41 = vmul.f32 %v1713_v19, %v5218_v33  ;;  %v1728_v51 = vmul.f32 %v1720_v43, %v5265_v36 }
 0x205   : > { %1989 = vmatpush1.msra.mxu0 %v1725_v45 }
 0x206   : > { %3030 = vmatmul.mubr.msk.f32.vlgmr.msra.gmra.mrb[4].mxu0 %vm1811_vm8, %v4736_v21  ;;  %2065 = vmatprep.subr.mxu1 %v1728_v51 }
 0x207   : > { %2066 = vmatpush1.msra.mxu1 %v1727_v41  ;;  %2042 = vmatprep.mubr.f32.mxu0 %v3251_v27 }
 0x208   : > { %3032 = vmatmul.mubr.msk.f32.vlgmr.msra.gmra.mrb[4].mxu1 %vm1811_vm8, %v4736_v21 }
 0x209   : > { %2119 = vmatprep.mubr.f32.mxu1 %v3251_v27 }
 0x20a   : > { %3031 = vmatmul.mubr.msk.f32.gmra.mrb[6].mxu0 %vm1811_vm8, %v4753_v53 }
 0x20b   : > { %2223 = vmatprep.mubr.f32.mxu0 %v3251_v27 }
 0x20c   : > { %3033 = vmatmul.mubr.msk.f32.gmra.mrb[6].mxu1 %vm1811_vm8, %v4753_v53 }
 0x20d   : > { %2312 = vmatprep.mubr.f32.mxu1 %v3251_v27 }
 0x2b4   : > { %v1961_v56 = vpop.f32.mrb[0].mxu1 }
 0x2b5   : > { %v1963_v38 = vpop.f32.mrb[1].mxu1  ;;  %v2128_v52 = vmax.f32 %v1961_v56, 0.0 }
 0x2b6   : > { %v2129_v50 = vmax.f32 %v1963_v38, 0.0 }
 0x2b7   : > { %v1884_v33 = vpop.f32.mrb[0].mxu0 }
 0x2b8   : > { %v1886_v26 = vpop.f32.mrb[1].mxu0  ;;  %v2126_v21 = vmax.f32 %v1884_v33, 0.0 }
 0x2b9   : > { %v1967_v15 = vpop.f32.mrb[2].mxu1  ;;  %v2127_v7 = vmax.f32 %v1886_v26, 0.0 }
 0x2ba   : > { %v2136_v39 = vmax.f32 %v1967_v15, 0.0  ;;  %v1969_v9 = vpop.f32.mrb[3].mxu1 }
 0x2bb   : > { %v1890_v63 = vpop.f32.mrb[2].mxu0  ;;  %v2137_v10 = vmax.f32 %v1969_v9, 0.0 }
 0x2bc   : > { %v2134_v46 = vmax.f32 %v1890_v63, 0.0  ;;  %v3131_v13 = vpack.c.bf16 %v2136_v39, %v2128_v52  ;;  %v1892_v57 = vpop.f32.mrb[3].mxu0 }
 0x2bd   : > { %v2135_v6 = vmax.f32 %v1892_v57, 0.0  ;;  %v3129_v53 = vpack.c.bf16 %v2137_v10, %v2129_v50 }
 0x2be   : > { %v3127_v22 = vpack.c.bf16 %v2134_v46, %v2126_v21 }
 0x2bf   : > { %v3125_v37 = vpack.c.bf16 %v2135_v6, %v2127_v7  ;;  %3130 = vmatprep.subr.bf16.mxu1 %v3129_v53 }
 0x2c0   : > { %3132 = vmatpush1.bf16.msra.mxu1 %v3131_v13 }
 0x2c1   : > { %3126 = vmatprep.subr.bf16.mxu0 %v3125_v37 }
 0x2c2   : > { %3128 = vmatpush1.bf16.msra.mxu0 %v3127_v22 }
 0x2c3   : > { %3038 = vmatmul.mubr.msk.f32.vlgmr.msra.gmra.mrb[8].mxu1 %vm2146_vm9, %v2142_v8 }
 0x2c4   : > { %2318 = vmatprep.mubr.f32.mxu1 %v3251_v27 }
 0x2c5   : > { %3034 = vmatmul.mubr.msk.f32.vlgmr.msra.gmra.mrb[8].mxu0 %vm2146_vm9, %v2142_v8 }
 0x2c6   : > { %2229 = vmatprep.mubr.f32.mxu0 %v3251_v27 }
 0x2c7   : > { %3039 = vmatmul.mubr.msk.f32.gmra.mrb[10].mxu1 %vm2146_vm9, %v2143_v14 }
 0x2c8   : > { %2324 = vmatprep.mubr.f32.mxu1 %v3251_v27 }
 0x2c9   : > { %3035 = vmatmul.mubr.msk.f32.gmra.mrb[10].mxu0 %vm2146_vm9, %v2143_v14 }
 0x2ca   : > { %2235 = vmatprep.mubr.f32.mxu0 %v3251_v27 }
 0x2cb   : > { %3040 = vmatmul.mubr.msk.f32.gmra.mrb[12].mxu1 %vm2146_vm9, %v2144_v35 }
 0x2cc   : > { %2330 = vmatprep.mubr.f32.mxu1 %v3251_v27 }
 0x2cd   : > { %3036 = vmatmul.mubr.msk.f32.gmra.mrb[12].mxu0 %vm2146_vm9, %v2144_v35 }
 0x2ce   : > { %2241 = vmatprep.mubr.f32.mxu0 %v3251_v27 }
 0x2cf   : > { %3041 = vmatmul.mubr.msk.f32.gmra.mrb[14].mxu1 %vm2146_vm9, %v2145_v58 }
 0x2d0   : > { %2490 = vmatprep.mubr.f32.mxu1 %v3251_v27 }
 0x2d1   : > { %3037 = vmatmul.mubr.msk.f32.gmra.mrb[14].mxu0 %vm2146_vm9, %v2145_v58 }
 0x2d2   : > { %2401 = vmatprep.mubr.f32.mxu0 %v3251_v27 }
 0x2d9   : > { %v2038_v48 = vpop.f32.mrb[4].mxu0 }
 0x2da   : > { %v2040_v59 = vpop.f32.mrb[5].mxu0  ;;  %v2130_v4 = vmax.f32 %v2038_v48, 0.0 }
 0x2db   : > { %v2115_v31 = vpop.f32.mrb[4].mxu1  ;;  %v2131_v61 = vmax.f32 %v2040_v59, 0.0 }
 0x2dc   : > { %v2117_v5 = vpop.f32.mrb[5].mxu1  ;;  %v2132_v11 = vmax.f32 %v2115_v31, 0.0 }
 0x2dd   : > { %v2044_v60 = vpop.f32.mrb[6].mxu0  ;;  %v2133_v16 = vmax.f32 %v2117_v5, 0.0 }
 0x2de   : > { %v2138_v30 = vmax.f32 %v2044_v60, 0.0  ;;  %v2046_v62 = vpop.f32.mrb[7].mxu0 }
 0x2df   : > { %v2139_v32 = vmax.f32 %v2046_v62, 0.0  ;;  %v2121_v17 = vpop.f32.mrb[6].mxu1 }
 0x2e0   : > { %v3135_v49 = vpack.c.bf16 %v2138_v30, %v2130_v4  ;;  %v2140_v54 = vmax.f32 %v2121_v17, 0.0  ;;  %v2123_v3 = vpop.f32.mrb[7].mxu1 }
 0x2e1   : > { %v3133_v2 = vpack.c.bf16 %v2139_v32, %v2131_v61  ;;  %v2141_v0 = vmax.f32 %v2123_v3, 0.0 }
 0x2e2   : > { %v3139_v18 = vpack.c.bf16 %v2140_v54, %v2132_v11 }
 0x2e3   : > { %v3137_v29 = vpack.c.bf16 %v2141_v0, %v2133_v16  ;;  %3134 = vmatprep.subr.bf16.mxu0 %v3133_v2 }
 0x2e4   : > { %3136 = vmatpush1.bf16.msra.mxu0 %v3135_v49 }
 0x2e5   : > { %3138 = vmatprep.subr.bf16.mxu1 %v3137_v29 }
 0x2e6   : > { %3140 = vmatpush1.bf16.msra.mxu1 %v3139_v18 }
 0x2e7   : > { %3042 = vmatmul.mubr.msk.f32.vlgmr.msra.gmra.mrb[16].mxu0 %vm2146_vm9, %v2142_v8 }
 0x2e8   : > { %2407 = vmatprep.mubr.f32.mxu0 %v3251_v27 }
 0x2e9   : > { %3046 = vmatmul.mubr.msk.f32.vlgmr.msra.gmra.mrb[16].mxu1 %vm2146_vm9, %v2142_v8 }
 0x2ea   : > { %2496 = vmatprep.mubr.f32.mxu1 %v3251_v27 }
 0x2eb   : > { %3043 = vmatmul.mubr.msk.f32.gmra.mrb[18].mxu0 %vm2146_vm9, %v2143_v14 }
 0x2ec   : > { %2413 = vmatprep.mubr.f32.mxu0 %v3251_v27 }
 0x2ed   : > { %3047 = vmatmul.mubr.msk.f32.gmra.mrb[18].mxu1 %vm2146_vm9, %v2143_v14  ;;  %v4911_v14 = vld [vmem:[%s4986_s5] sm:$0xff] }
 0x2ee   : > { %2502 = vmatprep.mubr.f32.mxu1 %v3251_v27 }
 0x2ef   : > { %3044 = vmatmul.mubr.msk.f32.gmra.mrb[20].mxu0 %vm2146_vm9, %v2144_v35 }
 0x2f0   : > { %2419 = vmatprep.mubr.f32.mxu0 %v3251_v27 }
 0x2f1   : > { %3048 = vmatmul.mubr.msk.f32.gmra.mrb[20].mxu1 %vm2146_vm9, %v2144_v35  ;;  %v2548_v35 = vld [vmem:[%s4986_s5 + $0x8] sm:$0xff] }
 0x2f2   : > { %2508 = vmatprep.mubr.f32.mxu1 %v3251_v27 }
 0x2f3   : > { %3045 = vmatmul.mubr.msk.f32.gmra.mrb[22].mxu0 %vm2146_vm9, %v2145_v58 }
 0x2f4   : > { %2620 = vmatprep.mubr.f32.mxu0 %v3251_v27 }
 0x2f5   : > { %3049 = vmatmul.mubr.msk.f32.gmra.mrb[22].mxu1 %vm2146_vm9, %v2145_v58 }
 0x2f6   : > { %2697 = vmatprep.mubr.f32.mxu1 %v3251_v27 }
 0x396   : > { %v2314_v23 = vpop.f32.mrb[8].mxu1 }
 0x397   : > { %v2316_v20 = vpop.f32.mrb[9].mxu1  ;;  %v2517_v1 = vmax.f32 %v2314_v23, 0.0 }
 0x398   : > { %v2225_v24 = vpop.f32.mrb[8].mxu0  ;;  %v2518_v28 = vmax.f32 %v2316_v20, 0.0 }
 0x399   : > { %v2227_v25 = vpop.f32.mrb[9].mxu0  ;;  %v2515_v42 = vmax.f32 %v2225_v24, 0.0 }
 0x39a   : > { %v2320_v44 = vpop.f32.mrb[10].mxu1  ;;  %v2516_v40 = vmax.f32 %v2227_v25, 0.0 }
 0x39b   : > { %v2525_v47 = vmax.f32 %v2320_v44, 0.0  ;;  %v2322_v12 = vpop.f32.mrb[11].mxu1 }
 0x39c   : > { %v2231_v34 = vpop.f32.mrb[10].mxu0  ;;  %v2526_v55 = vmax.f32 %v2322_v12, 0.0 }
 0x39d   : > { %v2523_v45 = vmax.f32 %v2231_v34, 0.0  ;;  %v3151_v19 = vpack.c.bf16 %v2525_v47, %v2517_v1  ;;  %v2233_v43 = vpop.f32.mrb[11].mxu0 }
 0x39e   : > { %v2524_v41 = vmax.f32 %v2233_v43, 0.0  ;;  %v3149_v36 = vpack.c.bf16 %v2526_v55, %v2518_v28  ;;  %v2326_v51 = vpop.f32.mrb[12].mxu1 }
 0x39f   : > { %v3143_v56 = vpack.c.bf16 %v2523_v45, %v2515_v42  ;;  %v2328_v38 = vpop.f32.mrb[13].mxu1  ;;  %v2533_v26 = vmax.f32 %v2326_v51, 0.0 }
 0x3a0   : > { %v3141_v33 = vpack.c.bf16 %v2524_v41, %v2516_v40  ;;  %v2237_v52 = vpop.f32.mrb[12].mxu0  ;;  %3150 = vmatprep.subr.bf16.mxu1 %v3149_v36  ;;  %v2534_v15 = vmax.f32 %v2328_v38, 0.0 }
 0x3a1   : > { %v2239_v50 = vpop.f32.mrb[13].mxu0  ;;  %3152 = vmatpush1.bf16.msra.mxu1 %v3151_v19  ;;  %v2531_v39 = vmax.f32 %v2237_v52, 0.0 }
 0x3a2   : > { %v2332_v21 = vpop.f32.mrb[14].mxu1  ;;  %3142 = vmatprep.subr.bf16.mxu0 %v3141_v33  ;;  %v2532_v63 = vmax.f32 %v2239_v50, 0.0 }
 0x3a3   : > { %v2541_v9 = vmax.f32 %v2332_v21, 0.0  ;;  %v2334_v7 = vpop.f32.mrb[15].mxu1  ;;  %3144 = vmatpush1.bf16.msra.mxu0 %v3143_v56 }
 0x3a4   : > { %v2243_v10 = vpop.f32.mrb[14].mxu0  ;;  %v2542_v46 = vmax.f32 %v2334_v7, 0.0 }
 0x3a5   : > { %v2539_v13 = vmax.f32 %v2243_v10, 0.0  ;;  %v3155_v57 = vpack.c.bf16 %v2541_v9, %v2533_v26  ;;  %v2245_v6 = vpop.f32.mrb[15].mxu0 }
 0x3a6   : > { %v2540_v53 = vmax.f32 %v2245_v6, 0.0  ;;  %v3153_v22 = vpack.c.bf16 %v2542_v46, %v2534_v15  ;;  %v2867_v6 = vld [vmem:[%s4952_s11 + $0x18] sm:$0xff] }
 0x3a7   : > { %v3147_v37 = vpack.c.bf16 %v2539_v13, %v2531_v39 }
 0x3a8   : > { %v3145_v8 = vpack.c.bf16 %v2540_v53, %v2532_v63  ;;  %3154 = vmatprep.subr.bf16.mxu1 %v3153_v22  ;;  %v2864_v22 = vld [vmem:[%s4952_s11] sm:$0xff] }
 0x3a9   : > { %3156 = vmatpush1.bf16.msra.mxu1 %v3155_v57  ;;  %v2866_v57 = vld [vmem:[%s4952_s11 + $0x10] sm:$0xff] }
 0x3aa   : > { %3146 = vmatprep.subr.bf16.mxu0 %v3145_v8 }
 0x3ab   : > { %3148 = vmatpush1.bf16.msra.mxu0 %v3147_v37 }
 0x3ac   : > { %3052 = vmatmul.mubr.msk.f32.vlgmr.msra.gmra.mrb[24].mxu1 %vm2549_vm10, %v4911_v14 }
 0x3ad   : > { %2703 = vmatprep.mubr.f32.mxu1 %v3251_v27 }
 0x3ae   : > { %3050 = vmatmul.mubr.msk.f32.vlgmr.msra.gmra.mrb[24].mxu0 %vm2549_vm10, %v4911_v14 }
 0x3af   : > { %2626 = vmatprep.mubr.f32.mxu0 %v3251_v27 }
 0x3b0   : > { %3053 = vmatmul.mubr.msk.f32.gmra.mrb[26].mxu1 %vm2549_vm10, %v2548_v35 }
 0x3b1   : > { %2851 = vmatprep.mubr.f32.mxu1 %v3251_v27 }
 0x3b2   : > { %3051 = vmatmul.mubr.msk.f32.gmra.mrb[26].mxu0 %vm2549_vm10, %v2548_v35 }
 0x3b3   : > { %2774 = vmatprep.mubr.f32.mxu0 %v3251_v27 }
 0x3ba   : > { %v2403_v58 = vpop.f32.mrb[16].mxu0 }
 0x3bb   : > { %v2405_v48 = vpop.f32.mrb[17].mxu0  ;;  %v2519_v60 = vmax.f32 %v2403_v58, 0.0 }
 0x3bc   : > { %v2492_v59 = vpop.f32.mrb[16].mxu1  ;;  %v2520_v62 = vmax.f32 %v2405_v48, 0.0 }
 0x3bd   : > { %v2494_v31 = vpop.f32.mrb[17].mxu1  ;;  %v2521_v11 = vmax.f32 %v2492_v59, 0.0 }
 0x3be   : > { %v2409_v5 = vpop.f32.mrb[18].mxu0  ;;  %v2522_v16 = vmax.f32 %v2494_v31, 0.0 }
 0x3bf   : > { %v2527_v4 = vmax.f32 %v2409_v5, 0.0  ;;  %v2411_v30 = vpop.f32.mrb[19].mxu0 }
 0x3c0   : > { %v2528_v61 = vmax.f32 %v2411_v30, 0.0  ;;  %v2498_v32 = vpop.f32.mrb[18].mxu1 }
 0x3c1   : > { %v3159_v17 = vpack.c.bf16 %v2527_v4, %v2519_v60  ;;  %v2529_v49 = vmax.f32 %v2498_v32, 0.0  ;;  %v2500_v54 = vpop.f32.mrb[19].mxu1 }
 0x3c2   : > { %v3157_v3 = vpack.c.bf16 %v2528_v61, %v2520_v62  ;;  %v2415_v2 = vpop.f32.mrb[20].mxu0  ;;  %v2530_v0 = vmax.f32 %v2500_v54, 0.0 }
 0x3c3   : > { %v3167_v18 = vpack.c.bf16 %v2529_v49, %v2521_v11  ;;  %v2417_v29 = vpop.f32.mrb[21].mxu0  ;;  %v2535_v25 = vmax.f32 %v2415_v2, 0.0 }
 0x3c4   : > { %v3165_v23 = vpack.c.bf16 %v2530_v0, %v2522_v16  ;;  %v2504_v20 = vpop.f32.mrb[20].mxu1  ;;  %3158 = vmatprep.subr.bf16.mxu0 %v3157_v3  ;;  %v2536_v42 = vmax.f32 %v2417_v29, 0.0 }
 0x3c5   : > { %v2506_v24 = vpop.f32.mrb[21].mxu1  ;;  %3160 = vmatpush1.bf16.msra.mxu0 %v3159_v17  ;;  %v2537_v34 = vmax.f32 %v2504_v20, 0.0 }
 0x3c6   : > { %v2421_v1 = vpop.f32.mrb[22].mxu0  ;;  %3166 = vmatprep.subr.bf16.mxu1 %v3165_v23  ;;  %v2538_v43 = vmax.f32 %v2506_v24, 0.0 }
 0x3c7   : > { %v2543_v28 = vmax.f32 %v2421_v1, 0.0  ;;  %v2423_v44 = vpop.f32.mrb[23].mxu0  ;;  %3168 = vmatpush1.bf16.msra.mxu1 %v3167_v18  ;;  %v2868_v1 = vld [vmem:[%s4952_s11 + $0x20] sm:$0xff] }
 0x3c8   : > { %v2544_v47 = vmax.f32 %v2423_v44, 0.0  ;;  %v2510_v12 = vpop.f32.mrb[22].mxu1  ;;  %v2870_v44 = vld [vmem:[%s4952_s11 + $0x30] sm:$0xff] }
 0x3c9   : > { %v3163_v40 = vpack.c.bf16 %v2543_v28, %v2535_v25  ;;  %v2545_v55 = vmax.f32 %v2510_v12, 0.0  ;;  %v2512_v45 = vpop.f32.mrb[23].mxu1  ;;  %v2869_v25 = vld [vmem:[%s4952_s11 + $0x28] sm:$0xff]  ;;  %v2871_v12 = vld [vmem:[%s4952_s11 + $0x38] sm:$0xff] }
 0x3ca   : > { %v3161_v19 = vpack.c.bf16 %v2544_v47, %v2536_v42  ;;  %v2546_v41 = vmax.f32 %v2512_v45, 0.0 }
 0x3cb   : > { %v3171_v36 = vpack.c.bf16 %v2545_v55, %v2537_v34 }
 0x3cc   : > { %v3169_v51 = vpack.c.bf16 %v2546_v41, %v2538_v43  ;;  %3162 = vmatprep.subr.bf16.mxu0 %v3161_v19 }
 0x3cd   : > { %3164 = vmatpush1.bf16.msra.mxu0 %v3163_v40 }
 0x3ce   : > { %3170 = vmatprep.subr.bf16.mxu1 %v3169_v51 }
 0x3cf   : > { %3172 = vmatpush1.bf16.msra.mxu1 %v3171_v36 }
 0x3d0   : > { %3054 = vmatmul.mubr.msk.f32.vlgmr.msra.gmra.mrb[28].mxu0 %vm2549_vm10, %v4911_v14 }
 0x3d1   : > { %2780 = vmatprep.mubr.f32.mxu0 %v3251_v27 }
 0x3d2   : > { %3056 = vmatmul.mubr.msk.f32.vlgmr.msra.gmra.mrb[28].mxu1 %vm2549_vm10, %v4911_v14  ;;  %v2865_v14 = vld [vmem:[%s4952_s11 + $0x8] sm:$0xff] }
 0x3d3   : > { %2857 = vmatprep.mubr.f32.mxu1 %v3251_v27 }
 0x3d4   : > { %3055 = vmatmul.mubr.msk.f32.gmra.mrb[30].mxu0 %vm2549_vm10, %v2548_v35 }
 0x3d6   : > { %3057 = vmatmul.mubr.msk.f32.gmra.mrb[30].mxu1 %vm2549_vm10, %v2548_v35 }
 0x47f   : > { %v2699_v56 = vpop.f32.mrb[24].mxu1 }
 0x480   : > { %2922 = vst [vmem:[%s4938_s21 + $0x50] sm:$0xff] %v2699_v56  ;;  %v2701_v27 = vpop.f32.mrb[25].mxu1 }
 0x481   : > { %v2622_v38 = vpop.f32.mrb[24].mxu0  ;;  %2923 = vst [vmem:[%s4938_s21 + $0x58] sm:$0xff] %v2701_v27 }
 0x482   : > { %2920 = vst [vmem:[%s4938_s21 + $0x40] sm:$0xff] %v2622_v38  ;;  %v2624_v33 = vpop.f32.mrb[25].mxu0 }
 0x483   : > { %2921 = vst [vmem:[%s4938_s21 + $0x48] sm:$0xff] %v2624_v33  ;;  %v2705_v52 = vpop.f32.mrb[26].mxu1 }
 0x484   : > { %v2874_v26 = vmul.f32 0.5, %v2705_v52  ;;  %2930 = vst [vmem:[%s4938_s21 + $0x90] sm:$0xff] %v2705_v52  ;;  %v2707_v50 = vpop.f32.mrb[27].mxu1 }
 0x485   : > { %v2628_v15 = vpop.f32.mrb[26].mxu0  ;;  %v2875_v21 = vmul.f32 0.5, %v2707_v50  ;;  %2931 = vst [vmem:[%s4938_s21 + $0x98] sm:$0xff] %v2707_v50 }
 0x486   : > { %v2872_v39 = vmul.f32 0.5, %v2628_v15  ;;  %2928 = vst [vmem:[%s4938_s21 + $0x80] sm:$0xff] %v2628_v15  ;;  %v2884_v9 = vmul.f32 1.442695, %v2874_v26  ;;  %v2630_v7 = vpop.f32.mrb[27].mxu0 }
 0x487   : > { %v2873_v63 = vmul.f32 0.5, %v2630_v7  ;;  %2929 = vst [vmem:[%s4938_s21 + $0x88] sm:$0xff] %v2630_v7  ;;  %v2886_v10 = vmul.f32 1.442695, %v2875_v21 }
 0x488   : > { %v2880_v46 = vmul.f32 1.442695, %v2872_v39  ;;  %3210 = vpow2.f32 %v2884_v9 }
 0x489   : > { %v2882_v13 = vmul.f32 1.442695, %v2873_v63  ;;  %3212 = vpow2.f32 %v2886_v10 }
 0x48a   : > { %3214 = vpow2.f32 %v2880_v46 }
 0x48b   : > { %3216 = vpow2.f32 %v2882_v13 }
 0x492   : > { %v3211_v53 = vpop.eup %3210 }
 0x493   : > { %v3213_v37 = vpop.eup %3212  ;;  %v2898_v8 = vmul.f32 %v3211_v53, %v2866_v57 }
 0x494   : > { %v3215_v35 = vpop.eup %3214  ;;  %v2899_v58 = vmul.f32 %v3213_v37, %v2867_v6 }
 0x495   : > { %v3217_v48 = vpop.eup %3216  ;;  %v2896_v59 = vmul.f32 %v3215_v35, %v2864_v22  ;;  %v2906_v31 = vadd.f32 %v2898_v8, %v2699_v56 }
 0x496   : > { %v2897_v5 = vmul.f32 %v3217_v48, %v2865_v14  ;;  %v2907_v60 = vadd.f32 %v2899_v58, %v2701_v27 }
 0x497   : > { %v2904_v4 = vadd.f32 %v2896_v59, %v2622_v38  ;;  %2914 = vst [vmem:[%s4938_s21 + $0x10] sm:$0xff] %v2906_v31 }
 0x498   : > { %v2905_v30 = vadd.f32 %v2897_v5, %v2624_v33  ;;  %2915 = vst [vmem:[%s4938_s21 + $0x18] sm:$0xff] %v2907_v60 }
 0x499   : > { %2912 = vst [vmem:[%s4938_s21] sm:$0xff] %v2904_v4 }
 0x49a   : > { %2913 = vst [vmem:[%s4938_s21 + $0x8] sm:$0xff] %v2905_v30 }
 0x4a3   : > { %v2776_v62 = vpop.f32.mrb[28].mxu0 }
 0x4a4   : > { %2924 = vst [vmem:[%s4938_s21 + $0x60] sm:$0xff] %v2776_v62  ;;  %v2778_v61 = vpop.f32.mrb[29].mxu0 }
 0x4a5   : > { %2925 = vst [vmem:[%s4938_s21 + $0x68] sm:$0xff] %v2778_v61  ;;  %v2853_v32 = vpop.f32.mrb[28].mxu1 }
 0x4a6   : > { %2926 = vst [vmem:[%s4938_s21 + $0x70] sm:$0xff] %v2853_v32  ;;  %v2855_v17 = vpop.f32.mrb[29].mxu1 }
 0x4a7   : > { %v2782_v11 = vpop.f32.mrb[30].mxu0  ;;  %2927 = vst [vmem:[%s4938_s21 + $0x78] sm:$0xff] %v2855_v17 }
 0x4a8   : > { %v2876_v49 = vmul.f32 0.5, %v2782_v11  ;;  %2932 = vst [vmem:[%s4938_s21 + $0xa0] sm:$0xff] %v2782_v11  ;;  %v2784_v54 = vpop.f32.mrb[31].mxu0 }
 0x4a9   : > { %v2877_v3 = vmul.f32 0.5, %v2784_v54  ;;  %2933 = vst [vmem:[%s4938_s21 + $0xa8] sm:$0xff] %v2784_v54  ;;  %v2859_v16 = vpop.f32.mrb[30].mxu1 }
 0x4aa   : > { %v2888_v2 = vmul.f32 1.442695, %v2876_v49  ;;  %v2878_v0 = vmul.f32 0.5, %v2859_v16  ;;  %2934 = vst [vmem:[%s4938_s21 + $0xb0] sm:$0xff] %v2859_v16  ;;  %v2861_v18 = vpop.f32.mrb[31].mxu1 }
 0x4ab   : > { %v2890_v29 = vmul.f32 1.442695, %v2877_v3  ;;  %v2879_v23 = vmul.f32 0.5, %v2861_v18  ;;  %2935 = vst [vmem:[%s4938_s21 + $0xb8] sm:$0xff] %v2861_v18 }
 0x4ac   : > { %3218 = vpow2.f32 %v2888_v2  ;;  %v2892_v20 = vmul.f32 1.442695, %v2878_v0 }
 0x4ad   : > { %3220 = vpow2.f32 %v2890_v29  ;;  %v2894_v24 = vmul.f32 1.442695, %v2879_v23 }
 0x4ae   : > { %3222 = vpow2.f32 %v2892_v20 }
 0x4af   : > { %3224 = vpow2.f32 %v2894_v24 }
 0x4b6   : > { %v3219_v28 = vpop.eup %3218 }
 0x4b7   : > { %v3221_v42 = vpop.eup %3220  ;;  %v2900_v47 = vmul.f32 %v3219_v28, %v2868_v1 }
 0x4b8   : > { %v3223_v40 = vpop.eup %3222  ;;  %v2901_v34 = vmul.f32 %v3221_v42, %v2869_v25 }
 0x4b9   : > { %v3225_v55 = vpop.eup %3224  ;;  %v2908_v45 = vadd.f32 %v2900_v47, %v2776_v62  ;;  %v2902_v19 = vmul.f32 %v3223_v40, %v2870_v44 }
 0x4ba   : > { %v2909_v43 = vadd.f32 %v2901_v34, %v2778_v61  ;;  %v2903_v41 = vmul.f32 %v3225_v55, %v2871_v12 }
 0x4bb   : > { %2916 = vst [vmem:[%s4938_s21 + $0x20] sm:$0xff] %v2908_v45  ;;  %v2910_v36 = vadd.f32 %v2902_v19, %v2853_v32 }
 0x4bc   : > { %2917 = vst [vmem:[%s4938_s21 + $0x28] sm:$0xff] %v2909_v43  ;;  %v2911_v51 = vadd.f32 %v2903_v41, %v2855_v17 }
 0x4bd   : > { %2918 = vst [vmem:[%s4938_s21 + $0x30] sm:$0xff] %v2910_v36 }
 0x4be   : > { %2919 = vst [vmem:[%s4938_s21 + $0x38] sm:$0xff] %v2911_v51 }
 0x4bf PF: > { %s17_s24 = sadd.s32 1, %s3232_s24  }
 0x4c0   : > { %p14_p4 = scmp.ge.s32.totalorder %s17_s24, 4  }
 0x4c2   :  { %16 = sbr.rel (!%p14_p4) target bundleno = 1 (0x1), region = 88 }

</bundles_post_ra>
